<compile_context>
chip_gen: v5e
topology: v5e:2x2
jax: 0.10.0
libtpu: 0.0.40
codegen_flags: <defaults>
</compile_context>

<pallas_src>
import functools

import jax
import jax.numpy as jnp
from jax.experimental import pallas as pl
from jax.experimental.pallas import tpu as pltpu


# ----------------------------------------------------------------------------
# helpers
# ----------------------------------------------------------------------------
def _pick_tile(n, max_tile=256):
    """Largest divisor of n from {max_tile, 512, 256, 128, 64, 32, 16, 8}."""
    for t in (max_tile, 512, 256, 128, 64, 32, 16, 8):
        if t <= max_tile and t <= n and n % t == 0:
            return t
    return n  # fallback: full extent (callers guard against huge fallbacks)


# ----------------------------------------------------------------------------
# Kernel 1: fused knn  (pairwise -||qi-pj||^2 row tile + streaming k-select)
# ----------------------------------------------------------------------------
def _knn_kernel(q_ref, pT_ref, sq_ref, idx_ref, *, k, n):
    # q_ref: (1, TQ, 3) row tile of points (channels-last)
    # pT_ref: (1, 3, N) all points (channels-first, as given to the module)
    # sq_ref: (1, 1, N) precomputed column squared norms
    q = q_ref[0].astype(jnp.float32)                       # (TQ, 3)
    pT = pT_ref[0].astype(jnp.float32)                     # (3, N)
    sq = sq_ref[0]                                         # (1, N)
    neg_inf = jnp.float32(-jnp.inf)

    # -||qi - pj||^2 = 2 qi.pj - ||qi||^2 - ||pj||^2  (pure VPU, no MXU)
    inner = (q[:, 0:1] * pT[0:1, :]
             + q[:, 1:2] * pT[1:2, :]
             + q[:, 2:3] * pT[2:3, :])                     # (TQ, N)
    qq = (q[:, 0:1] * q[:, 0:1]
          + q[:, 1:2] * q[:, 1:2]
          + q[:, 2:3] * q[:, 2:3])                         # (TQ, 1)
    d = 2.0 * inner - qq - sq                              # (TQ, N)

    tq = d.shape[0]
    col = jax.lax.broadcasted_iota(jnp.int32, (tq, n), 1)
    colf = col.astype(jnp.float32)
    kcol = jax.lax.broadcasted_iota(jnp.int32, (tq, k), 1)
    out = jnp.zeros((tq, k), jnp.int32)

    # streaming top-k: k passes of (row max, first index achieving it, mask)
    for j in range(k):
        m = jnp.max(d, axis=-1, keepdims=True)                        # (TQ, 1)
        cand = jnp.where(d >= m, colf, jnp.float32(n))
        sel = jnp.min(cand, axis=-1, keepdims=True).astype(jnp.int32)  # (TQ, 1)
        out = jnp.where(kcol == j, sel, out)
        d = jnp.where(col == sel, neg_inf, d)
    idx_ref[0] = out


def knn_indices(pts_bnc, pts_b3n, sqn, k, *, max_tile=256,
                dist_vmem_budget=4 << 20):
    """Nearest-neighbor indices (descending similarity): (B, N, k) int32."""
    B, N, C = pts_bnc.shape
    assert C == 3 and k <= N
    # cap the row tile so the in-kernel (TQ, N) f32 distance temp stays small
    # (v7x has only 64 MiB physical VMEM / 32 MiB default scoped)
    cap = max(8, dist_vmem_budget // (N * 4))
    TQ = _pick_tile(N, min(max_tile, cap))
    assert TQ * N * 4 <= 16 << 20, "pad N: knn row tile would blow VMEM"

    kernel = functools.partial(_knn_kernel, k=k, n=N)
    return pl.pallas_call(
        kernel,
        out_shape=jax.ShapeDtypeStruct((B, N, k), jnp.int32),
        grid=(B, N // TQ),
        in_specs=[pl.BlockSpec((1, TQ, 3), lambda b, i: (b, i, 0)),
                  pl.BlockSpec((1, 3, N), lambda b, i: (b, 0, 0)),
                  pl.BlockSpec((1, 1, N), lambda b, i: (b, 0, 0))],
        out_specs=pl.BlockSpec((1, TQ, k), lambda b, i: (b, i, 0)),
        compiler_params=pltpu.CompilerParams(
            dimension_semantics=("parallel", "parallel"),
            vmem_limit_bytes=32 * 1024 * 1024),
    )(pts_bnc, pts_b3n, sqn)


# ----------------------------------------------------------------------------
# Kernel 2: per-point MLP (fused chain of 1x1-conv / linear layers), N-tiled
# ----------------------------------------------------------------------------
def pointwise_mlp(x, layers, *, max_tile=512):
    """x: (B, N, Cin). layers: list of (W (Cin,Cout), b (1,Cout) f32, relu?)."""
    B, N, Cin = x.shape
    TN = _pick_tile(N, max_tile)
    Cout = layers[-1][0].shape[1]
    n_layers = len(layers)
    relu_flags = tuple(bool(r) for (_, _, r) in layers)
    compute_dtype = x.dtype

    def kernel(x_ref, *refs):
        o_ref = refs[-1]
        h = x_ref[0]
        for l in range(n_layers):
            w = refs[2 * l][...]
            bias = refs[2 * l + 1][...]
            h = jnp.dot(h, w, preferred_element_type=jnp.float32) + bias
            if relu_flags[l]:
                h = jax.nn.relu(h)
            if l < n_layers - 1:
                h = h.astype(compute_dtype)
        o_ref[0] = h.astype(o_ref.dtype)

    weight_args = []
    in_specs = [pl.BlockSpec((1, TN, Cin), lambda b, i: (b, i, 0))]
    for (W, bvec, _) in layers:
        weight_args += [W, bvec]
        in_specs += [pl.BlockSpec(W.shape, lambda b, i: (0, 0)),
                     pl.BlockSpec(bvec.shape, lambda b, i: (0, 0))]

    return pl.pallas_call(
        kernel,
        out_shape=jax.ShapeDtypeStruct((B, N, Cout), compute_dtype),
        grid=(B, N // TN),
        in_specs=in_specs,
        out_specs=pl.BlockSpec((1, TN, Cout), lambda b, i: (b, i, 0)),
        compiler_params=pltpu.CompilerParams(
            dimension_semantics=("parallel", "parallel")),
    )(x, *weight_args)


# ----------------------------------------------------------------------------
# Kernel 3: final per-point matmul fused with global max over points
#           (column-tiled, bias hoisted, accumulate directly into output)
# ----------------------------------------------------------------------------
def matmul_globalmax(x, W, bias, *, tile_n=256, tile_c=256):
    """out[b, 0, :] = max_n (x[b, n, :] @ W) + bias  ->  (B, 1, Cout) float32."""
    B, N, Cin = x.shape
    Cout = W.shape[1]
    TN = _pick_tile(N, tile_n)
    TC = min(tile_c, Cout)
    assert Cout % TC == 0
    row_chunk = min(TN, 128)              # bound (rows, TC) f32 temp <= 32 vregs
    assert TN % row_chunk == 0
    n_chunks = TN // row_chunk

    def kernel(x_ref, w_ref, b_ref, o_ref):
        n_id = pl.program_id(2)

        @pl.when(n_id == 0)
        def _():
            o_ref[...] = jnp.full(o_ref.shape, -jnp.inf, o_ref.dtype)

        w = w_ref[...]
        acc = o_ref[0]                                     # (1, TC), resident block
        for s in range(n_chunks):
            xs = x_ref[0, s * row_chunk:(s + 1) * row_chunk, :]
            h = jnp.dot(xs, w, preferred_element_type=jnp.float32)
            acc = jnp.maximum(acc, jnp.max(h, axis=0, keepdims=True))
        o_ref[0] = acc

        @pl.when(n_id == pl.num_programs(2) - 1)
        def _():
            # bias hoisted out of the per-tile path: max(xW + b) == max(xW) + b
            o_ref[0] = o_ref[0] + b_ref[...]

    return pl.pallas_call(
        kernel,
        out_shape=jax.ShapeDtypeStruct((B, 1, Cout), jnp.float32),
        grid=(B, Cout // TC, N // TN),
        in_specs=[pl.BlockSpec((1, TN, Cin), lambda b, c, n: (b, n, 0)),
                  pl.BlockSpec((Cin, TC), lambda b, c, n: (0, c)),
                  pl.BlockSpec((1, TC), lambda b, c, n: (0, c))],
        out_specs=pl.BlockSpec((1, 1, TC), lambda b, c, n: (b, 0, c)),
        compiler_params=pltpu.CompilerParams(
            dimension_semantics=("parallel", "parallel", "arbitrary")),
    )(x, W, bias)


# ----------------------------------------------------------------------------
# Glue: local_maxpool (k-step running max of neighbor gathers)
# ----------------------------------------------------------------------------
def local_maxpool(feat_bnc, idx):
    # feat: (B, N, C), idx: (B, N, k) -> max over each point's k neighbors,
    # as a k-step running max so no (B, N, k, C) intermediate is materialized.
    k = idx.shape[-1]

    def one(f, ii):                       # f: (N, C), ii: (N, k)
        out = jnp.take(f, ii[:, 0], axis=0)
        for j in range(1, k):
            out = jnp.maximum(out, jnp.take(f, ii[:, j], axis=0))
        return out

    return jax.vmap(one)(feat_bnc, idx)


# ----------------------------------------------------------------------------
# Full forward pass
# ----------------------------------------------------------------------------
def foldnet_encoder_forward(pts, params, k, compute_dtype=jnp.bfloat16):
    """pts: (B, 3, N) as in the PyTorch module.  Returns (B, 1, feat_dims) f32.

    compute_dtype=bfloat16 (default, good on v5e/v6e/v7x) halves activation and
    weight HBM bytes for the DMA-bound point MLPs; accumulation, biases, knn
    distances and the returned features stay float32.  Pass jnp.float32 for
    bit-closer parity with the f32 PyTorch reference.
    """
    pts = pts.astype(jnp.float32)                               # (B, 3, N)
    pts_bnc = jnp.transpose(pts, (0, 2, 1))                     # (B, N, 3)
    B, N, _ = pts_bnc.shape
    sqn = jnp.sum(pts * pts, axis=1, keepdims=True)             # (B, 1, N)
    cast = lambda w: w.astype(compute_dtype)

    # knn: fused distance + streaming top-k (indices only, no (B,N,N) matrix)
    idx = knn_indices(pts_bnc, pts, sqn, k)                     # (B, N, k)

    # local_cov: outer product of nearest (self) and 2nd-nearest neighbor
    gather = jax.vmap(lambda p, i: jnp.take(p, i, axis=0))
    n0 = gather(pts_bnc, idx[:, :, 0])                          # (B, N, 3)
    n1 = gather(pts_bnc, idx[:, :, 1])                          # (B, N, 3)
    cov = (n0[:, :, :, None] * n1[:, :, None, :]).reshape(B, N, 9)
    x12 = jnp.concatenate([pts_bnc, cov], axis=-1).astype(compute_dtype)

    # mlp1: 12 -> 64 -> 64 -> 64, ReLU each (one fused Pallas kernel)
    h = pointwise_mlp(
        x12,
        [(cast(params["w1"]), params["b1"], True),
         (cast(params["w2"]), params["b2"], True),
         (cast(params["w3"]), params["b3"], True)],
        max_tile=512)                                           # (B, N, 64)

    # graph layer.  Folding linearN into convN is exact: the reference module
    # has no nonlinearity between them.
    h = local_maxpool(h, idx)                                   # (B, N, 64)
    w_lc1 = params["wl1"] @ params["wc1"]
    b_lc1 = params["bl1"] @ params["wc1"] + params["bc1"]
    h = pointwise_mlp(h, [(cast(w_lc1), b_lc1, True)], max_tile=256)  # (B,N,128)

    h = local_maxpool(h, idx)                                   # (B, N, 128)
    w_lc2 = params["wl2"] @ params["wc2"]
    b_lc2 = params["bl2"] @ params["wc2"] + params["bc2"]
    g = matmul_globalmax(h, cast(w_lc2), b_lc2)                 # (B, 1, 1024)

    # mlp2 operates on a single point (M=1): plain batched matmuls, no kernel
    g2 = g[:, 0, :]                                             # (B, 1024)
    g2 = jax.nn.relu(g2 @ params["wm1"] + params["bm1"])
    g2 = g2 @ params["wm2"] + params["bm2"]
    return g2[:, None, :]                                       # (B, 1, F)


# ----------------------------------------------------------------------------
# Deterministic synthetic parameters (shapes per the module __init__)
# ----------------------------------------------------------------------------
def init_params(key, feat_dims):
    shapes = {
        "w1": (12, 64),    "b1": (1, 64),        # mlp1 conv 12->64
        "w2": (64, 64),    "b2": (1, 64),        # mlp1 conv 64->64
        "w3": (64, 64),    "b3": (1, 64),        # mlp1 conv 64->64
        "wl1": (64, 64),   "bl1": (1, 64),       # linear1
        "wc1": (64, 128),  "bc1": (1, 128),      # conv1
        "wl2": (128, 128), "bl2": (1, 128),      # linear2
        "wc2": (128, 1024), "bc2": (1, 1024),    # conv2
        "wm1": (1024, feat_dims), "bm1": (1, feat_dims),   # mlp2 conv
        "wm2": (feat_dims, feat_dims), "bm2": (1, feat_dims),
    }
    params = {}
    keys = jax.random.split(key, len(shapes))
    for (name, shape), kk in zip(shapes.items(), keys):
        fan_in = shape[0] if name.startswith("w") else shape[1]
        params[name] = (jax.random.normal(kk, shape, jnp.float32)
                        / jnp.sqrt(jnp.float32(fan_in)))
    return params


if __name__ == "__main__":
    B, N, K, FEAT = 2, 16, 4, 32          # small shapes consistent with forward
    key = jax.random.PRNGKey(0)
    kp, kx = jax.random.split(key)
    params = init_params(kp, FEAT)
    pts = jax.random.normal(kx, (B, 3, N), jnp.float32)   # PyTorch-style (B,3,N)

    forward = jax.jit(foldnet_encoder_forward, static_argnums=(2,))
    feat = forward(pts, params, K)
    feat = jax.block_until_ready(feat)

    assert feat.shape == (B, 1, FEAT), feat.shape
    assert bool(jnp.all(jnp.isfinite(feat)))
    print("KERNEL_OK")
</pallas_src>

<mosaic_0001>
module attributes {stable_mosaic.version = 11 : i64} {
  func.func @_knn_kernel(%arg0: i32, %arg1: i32, %arg2: memref<1x16x3xf32, #tpu.memory_space<vmem>>, %arg3: memref<1x3x16xf32, #tpu.memory_space<vmem>>, %arg4: memref<1x1x16xf32, #tpu.memory_space<vmem>>, %arg5: memref<1x16x4xi32, #tpu.memory_space<vmem>>) attributes {dimension_semantics = [#tpu.dimension_semantics<parallel>, #tpu.dimension_semantics<parallel>], iteration_bounds = array<i64: 2, 1>, scalar_prefetch = 0 : i64, scratch_operands = 0 : i64, tpu.core_type = #tpu.core_type<tc>, window_params = [{transform_indices = @transform_0, window_bounds = array<i64: 1, 16, 3>}, {transform_indices = @transform_1, window_bounds = array<i64: 1, 3, 16>}, {transform_indices = @transform_2, window_bounds = array<i64: 1, 1, 16>}, {transform_indices = @transform_3, window_bounds = array<i64: 1, 16, 4>}]} {
    %c0 = arith.constant 0 : index
    %c0_0 = arith.constant 0 : index
    %c0_1 = arith.constant 0 : index
    %0 = vector.load %arg2[%c0, %c0_0, %c0_1] : memref<1x16x3xf32, #tpu.memory_space<vmem>>, vector<1x16x3xf32>
    %1 = vector.shape_cast %0 : vector<1x16x3xf32> to vector<16x3xf32>
    %c0_2 = arith.constant 0 : index
    %c0_3 = arith.constant 0 : index
    %c0_4 = arith.constant 0 : index
    %2 = vector.load %arg3[%c0_2, %c0_3, %c0_4] : memref<1x3x16xf32, #tpu.memory_space<vmem>>, vector<1x3x16xf32>
    %3 = vector.shape_cast %2 : vector<1x3x16xf32> to vector<3x16xf32>
    %c0_5 = arith.constant 0 : index
    %c0_6 = arith.constant 0 : index
    %c0_7 = arith.constant 0 : index
    %4 = vector.load %arg4[%c0_5, %c0_6, %c0_7] : memref<1x1x16xf32, #tpu.memory_space<vmem>>, vector<1x1x16xf32>
    %5 = vector.shape_cast %4 : vector<1x1x16xf32> to vector<1x16xf32>
    %6 = vector.extract_strided_slice %1 {offsets = [0, 0], sizes = [16, 1], strides = [1, 1]} : vector<16x3xf32> to vector<16x1xf32>
    %7 = vector.extract_strided_slice %3 {offsets = [0, 0], sizes = [1, 16], strides = [1, 1]} : vector<3x16xf32> to vector<1x16xf32>
    %8 = vector.broadcast %6 : vector<16x1xf32> to vector<16x16xf32>
    %9 = vector.broadcast %7 : vector<1x16xf32> to vector<16x16xf32>
    %10 = arith.mulf %8, %9 : vector<16x16xf32>
    %11 = vector.extract_strided_slice %1 {offsets = [0, 1], sizes = [16, 1], strides = [1, 1]} : vector<16x3xf32> to vector<16x1xf32>
    %12 = vector.extract_strided_slice %3 {offsets = [1, 0], sizes = [1, 16], strides = [1, 1]} : vector<3x16xf32> to vector<1x16xf32>
    %13 = vector.broadcast %11 : vector<16x1xf32> to vector<16x16xf32>
    %14 = vector.broadcast %12 : vector<1x16xf32> to vector<16x16xf32>
    %15 = arith.mulf %13, %14 : vector<16x16xf32>
    %16 = arith.addf %10, %15 : vector<16x16xf32>
    %17 = vector.extract_strided_slice %1 {offsets = [0, 2], sizes = [16, 1], strides = [1, 1]} : vector<16x3xf32> to vector<16x1xf32>
    %18 = vector.extract_strided_slice %3 {offsets = [2, 0], sizes = [1, 16], strides = [1, 1]} : vector<3x16xf32> to vector<1x16xf32>
    %19 = vector.broadcast %17 : vector<16x1xf32> to vector<16x16xf32>
    %20 = vector.broadcast %18 : vector<1x16xf32> to vector<16x16xf32>
    %21 = arith.mulf %19, %20 : vector<16x16xf32>
    %22 = arith.addf %16, %21 : vector<16x16xf32>
    %23 = vector.extract_strided_slice %1 {offsets = [0, 0], sizes = [16, 1], strides = [1, 1]} : vector<16x3xf32> to vector<16x1xf32>
    %24 = vector.extract_strided_slice %1 {offsets = [0, 0], sizes = [16, 1], strides = [1, 1]} : vector<16x3xf32> to vector<16x1xf32>
    %25 = arith.mulf %23, %24 : vector<16x1xf32>
    %26 = vector.extract_strided_slice %1 {offsets = [0, 1], sizes = [16, 1], strides = [1, 1]} : vector<16x3xf32> to vector<16x1xf32>
    %27 = vector.extract_strided_slice %1 {offsets = [0, 1], sizes = [16, 1], strides = [1, 1]} : vector<16x3xf32> to vector<16x1xf32>
    %28 = arith.mulf %26, %27 : vector<16x1xf32>
    %29 = arith.addf %25, %28 : vector<16x1xf32>
    %30 = vector.extract_strided_slice %1 {offsets = [0, 2], sizes = [16, 1], strides = [1, 1]} : vector<16x3xf32> to vector<16x1xf32>
    %31 = vector.extract_strided_slice %1 {offsets = [0, 2], sizes = [16, 1], strides = [1, 1]} : vector<16x3xf32> to vector<16x1xf32>
    %32 = arith.mulf %30, %31 : vector<16x1xf32>
    %33 = arith.addf %29, %32 : vector<16x1xf32>
    %cst = arith.constant 2.000000e+00 : f32
    %34 = vector.broadcast %cst : f32 to vector<16x16xf32>
    %35 = arith.mulf %34, %22 : vector<16x16xf32>
    %36 = vector.broadcast %33 : vector<16x1xf32> to vector<16x16xf32>
    %37 = arith.subf %35, %36 : vector<16x16xf32>
    %38 = vector.broadcast %5 : vector<1x16xf32> to vector<16x16xf32>
    %39 = arith.subf %37, %38 : vector<16x16xf32>
    %40 = tpu.iota {dimensions = array<i32: 1>} : vector<16x16xi32>
    %41 = arith.sitofp %40 : vector<16x16xi32> to vector<16x16xf32>
    %42 = tpu.iota {dimensions = array<i32: 1>} : vector<16x4xi32>
    %c0_i32 = arith.constant 0 : i32
    %43 = vector.broadcast %c0_i32 : i32 to vector<16x4xi32>
    %cst_8 = arith.constant dense<0xFF800000> : vector<16xf32>
    %44 = vector.multi_reduction <maximumf>, %39, %cst_8 [1] : vector<16x16xf32> to vector<16xf32>
    %45 = vector.shape_cast %44 : vector<16xf32> to vector<16x1xf32>
    %46 = vector.broadcast %45 : vector<16x1xf32> to vector<16x16xf32>
    %47 = arith.cmpf oge, %39, %46 : vector<16x16xf32>
    %cst_9 = arith.constant 1.600000e+01 : f32
    %48 = vector.broadcast %cst_9 : f32 to vector<16x16xf32>
    %49 = arith.select %47, %41, %48 : vector<16x16xi1>, vector<16x16xf32>
    %cst_10 = arith.constant dense<0x7F800000> : vector<16xf32>
    %50 = vector.multi_reduction <minimumf>, %49, %cst_10 [1] : vector<16x16xf32> to vector<16xf32>
    %51 = vector.shape_cast %50 : vector<16xf32> to vector<16x1xf32>
    %52 = arith.fptosi %51 : vector<16x1xf32> to vector<16x1xi32>
    %c0_i32_11 = arith.constant 0 : i32
    %53 = vector.broadcast %c0_i32_11 : i32 to vector<16x4xi32>
    %54 = arith.cmpi eq, %42, %53 : vector<16x4xi32>
    %55 = vector.shape_cast %52 : vector<16x1xi32> to vector<16x1xi32>
    %56 = vector.broadcast %55 : vector<16x1xi32> to vector<16x4xi32>
    %57 = arith.select %54, %56, %43 : vector<16x4xi1>, vector<16x4xi32>
    %58 = vector.broadcast %52 : vector<16x1xi32> to vector<16x16xi32>
    %59 = arith.cmpi eq, %40, %58 : vector<16x16xi32>
    %cst_12 = arith.constant 0xFF800000 : f32
    %60 = vector.broadcast %cst_12 : f32 to vector<16x16xf32>
    %61 = arith.select %59, %60, %39 : vector<16x16xi1>, vector<16x16xf32>
    %cst_13 = arith.constant dense<0xFF800000> : vector<16xf32>
    %62 = vector.multi_reduction <maximumf>, %61, %cst_13 [1] : vector<16x16xf32> to vector<16xf32>
    %63 = vector.shape_cast %62 : vector<16xf32> to vector<16x1xf32>
    %64 = vector.broadcast %63 : vector<16x1xf32> to vector<16x16xf32>
    %65 = arith.cmpf oge, %61, %64 : vector<16x16xf32>
    %cst_14 = arith.constant 1.600000e+01 : f32
    %66 = vector.broadcast %cst_14 : f32 to vector<16x16xf32>
    %67 = arith.select %65, %41, %66 : vector<16x16xi1>, vector<16x16xf32>
    %cst_15 = arith.constant dense<0x7F800000> : vector<16xf32>
    %68 = vector.multi_reduction <minimumf>, %67, %cst_15 [1] : vector<16x16xf32> to vector<16xf32>
    %69 = vector.shape_cast %68 : vector<16xf32> to vector<16x1xf32>
    %70 = arith.fptosi %69 : vector<16x1xf32> to vector<16x1xi32>
    %c1_i32 = arith.constant 1 : i32
    %71 = vector.broadcast %c1_i32 : i32 to vector<16x4xi32>
    %72 = arith.cmpi eq, %42, %71 : vector<16x4xi32>
    %73 = vector.shape_cast %70 : vector<16x1xi32> to vector<16x1xi32>
    %74 = vector.broadcast %73 : vector<16x1xi32> to vector<16x4xi32>
    %75 = arith.select %72, %74, %57 : vector<16x4xi1>, vector<16x4xi32>
    %76 = vector.broadcast %70 : vector<16x1xi32> to vector<16x16xi32>
    %77 = arith.cmpi eq, %40, %76 : vector<16x16xi32>
    %cst_16 = arith.constant 0xFF800000 : f32
    %78 = vector.broadcast %cst_16 : f32 to vector<16x16xf32>
    %79 = arith.select %77, %78, %61 : vector<16x16xi1>, vector<16x16xf32>
    %cst_17 = arith.constant dense<0xFF800000> : vector<16xf32>
    %80 = vector.multi_reduction <maximumf>, %79, %cst_17 [1] : vector<16x16xf32> to vector<16xf32>
    %81 = vector.shape_cast %80 : vector<16xf32> to vector<16x1xf32>
    %82 = vector.broadcast %81 : vector<16x1xf32> to vector<16x16xf32>
    %83 = arith.cmpf oge, %79, %82 : vector<16x16xf32>
    %cst_18 = arith.constant 1.600000e+01 : f32
    %84 = vector.broadcast %cst_18 : f32 to vector<16x16xf32>
    %85 = arith.select %83, %41, %84 : vector<16x16xi1>, vector<16x16xf32>
    %cst_19 = arith.constant dense<0x7F800000> : vector<16xf32>
    %86 = vector.multi_reduction <minimumf>, %85, %cst_19 [1] : vector<16x16xf32> to vector<16xf32>
    %87 = vector.shape_cast %86 : vector<16xf32> to vector<16x1xf32>
    %88 = arith.fptosi %87 : vector<16x1xf32> to vector<16x1xi32>
    %c2_i32 = arith.constant 2 : i32
    %89 = vector.broadcast %c2_i32 : i32 to vector<16x4xi32>
    %90 = arith.cmpi eq, %42, %89 : vector<16x4xi32>
    %91 = vector.shape_cast %88 : vector<16x1xi32> to vector<16x1xi32>
    %92 = vector.broadcast %91 : vector<16x1xi32> to vector<16x4xi32>
    %93 = arith.select %90, %92, %75 : vector<16x4xi1>, vector<16x4xi32>
    %94 = vector.broadcast %88 : vector<16x1xi32> to vector<16x16xi32>
    %95 = arith.cmpi eq, %40, %94 : vector<16x16xi32>
    %cst_20 = arith.constant 0xFF800000 : f32
    %96 = vector.broadcast %cst_20 : f32 to vector<16x16xf32>
    %97 = arith.select %95, %96, %79 : vector<16x16xi1>, vector<16x16xf32>
    %cst_21 = arith.constant dense<0xFF800000> : vector<16xf32>
    %98 = vector.multi_reduction <maximumf>, %97, %cst_21 [1] : vector<16x16xf32> to vector<16xf32>
    %99 = vector.shape_cast %98 : vector<16xf32> to vector<16x1xf32>
    %100 = vector.broadcast %99 : vector<16x1xf32> to vector<16x16xf32>
    %101 = arith.cmpf oge, %97, %100 : vector<16x16xf32>
    %cst_22 = arith.constant 1.600000e+01 : f32
    %102 = vector.broadcast %cst_22 : f32 to vector<16x16xf32>
    %103 = arith.select %101, %41, %102 : vector<16x16xi1>, vector<16x16xf32>
    %cst_23 = arith.constant dense<0x7F800000> : vector<16xf32>
    %104 = vector.multi_reduction <minimumf>, %103, %cst_23 [1] : vector<16x16xf32> to vector<16xf32>
    %105 = vector.shape_cast %104 : vector<16xf32> to vector<16x1xf32>
    %106 = arith.fptosi %105 : vector<16x1xf32> to vector<16x1xi32>
    %c3_i32 = arith.constant 3 : i32
    %107 = vector.broadcast %c3_i32 : i32 to vector<16x4xi32>
    %108 = arith.cmpi eq, %42, %107 : vector<16x4xi32>
    %109 = vector.shape_cast %106 : vector<16x1xi32> to vector<16x1xi32>
    %110 = vector.broadcast %109 : vector<16x1xi32> to vector<16x4xi32>
    %111 = arith.select %108, %110, %93 : vector<16x4xi1>, vector<16x4xi32>
    %c0_24 = arith.constant 0 : index
    %c0_25 = arith.constant 0 : index
    %c0_26 = arith.constant 0 : index
    %112 = vector.load %arg5[%c0_24, %c0_25, %c0_26] : memref<1x16x4xi32, #tpu.memory_space<vmem>>, vector<1x16x4xi32>
    %113 = vector.shape_cast %112 : vector<1x16x4xi32> to vector<16x4xi32>
    %114 = vector.shape_cast %111 : vector<16x4xi32> to vector<1x16x4xi32>
    tpu.vector_store %arg5[%c0_24, %c0_25, %c0_26], %114 {strides = array<i32>} : memref<1x16x4xi32, #tpu.memory_space<vmem>>, vector<1x16x4xi32>,
    return
  }
  func.func @transform_0(%arg0: i32, %arg1: i32) -> (i32, i32, i32) {
    %c0_i32 = arith.constant 0 : i32
    %c0_i32_0 = arith.constant 0 : i32
    return %arg0, %arg1, %c0_i32 : i32, i32, i32
  }
  func.func @transform_1(%arg0: i32, %arg1: i32) -> (i32, i32, i32) {
    %c0_i32 = arith.constant 0 : i32
    %c0_i32_0 = arith.constant 0 : i32
    %c0_i32_1 = arith.constant 0 : i32
    return %arg0, %c0_i32, %c0_i32_0 : i32, i32, i32
  }
  func.func @transform_2(%arg0: i32, %arg1: i32) -> (i32, i32, i32) {
    %c0_i32 = arith.constant 0 : i32
    %c0_i32_0 = arith.constant 0 : i32
    %c0_i32_1 = arith.constant 0 : i32
    return %arg0, %c0_i32, %c0_i32_0 : i32, i32, i32
  }
  func.func @transform_3(%arg0: i32, %arg1: i32) -> (i32, i32, i32) {
    %c0_i32 = arith.constant 0 : i32
    %c0_i32_0 = arith.constant 0 : i32
    return %arg0, %arg1, %c0_i32 : i32, i32, i32
  }
}

module attributes {stable_mosaic.version = 11 : i64} {
  func.func @kernel(%arg0: i32, %arg1: i32, %arg2: memref<1x16x12xbf16, #tpu.memory_space<vmem>>, %arg3: memref<12x64xbf16, #tpu.memory_space<vmem>>, %arg4: memref<1x64xf32, #tpu.memory_space<vmem>>, %arg5: memref<64x64xbf16, #tpu.memory_space<vmem>>, %arg6: memref<1x64xf32, #tpu.memory_space<vmem>>, %arg7: memref<64x64xbf16, #tpu.memory_space<vmem>>, %arg8: memref<1x64xf32, #tpu.memory_space<vmem>>, %arg9: memref<1x16x64xbf16, #tpu.memory_space<vmem>>) attributes {dimension_semantics = [#tpu.dimension_semantics<parallel>, #tpu.dimension_semantics<parallel>], iteration_bounds = array<i64: 2, 1>, scalar_prefetch = 0 : i64, scratch_operands = 0 : i64, tpu.core_type = #tpu.core_type<tc>, window_params = [{transform_indices = @transform_0, window_bounds = array<i64: 1, 16, 12>}, {pipeline_mode = #tpu.pipeline_mode<synchronous>, transform_indices = @transform_1, window_bounds = array<i64: 12, 64>}, {pipeline_mode = #tpu.pipeline_mode<synchronous>, transform_indices = @transform_2, window_bounds = array<i64: 1, 64>}, {pipeline_mode = #tpu.pipeline_mode<synchronous>, transform_indices = @transform_3, window_bounds = array<i64: 64, 64>}, {pipeline_mode = #tpu.pipeline_mode<synchronous>, transform_indices = @transform_4, window_bounds = array<i64: 1, 64>}, {pipeline_mode = #tpu.pipeline_mode<synchronous>, transform_indices = @transform_5, window_bounds = array<i64: 64, 64>}, {pipeline_mode = #tpu.pipeline_mode<synchronous>, transform_indices = @transform_6, window_bounds = array<i64: 1, 64>}, {transform_indices = @transform_7, window_bounds = array<i64: 1, 16, 64>}]} {
    %c0 = arith.constant 0 : index
    %c0_0 = arith.constant 0 : index
    %c0_1 = arith.constant 0 : index
    %0 = vector.load %arg2[%c0, %c0_0, %c0_1] : memref<1x16x12xbf16, #tpu.memory_space<vmem>>, vector<1x16x12xbf16>
    %1 = vector.shape_cast %0 : vector<1x16x12xbf16> to vector<16x12xbf16>
    %c0_2 = arith.constant 0 : index
    %c0_3 = arith.constant 0 : index
    %2 = vector.load %arg3[%c0_2, %c0_3] : memref<12x64xbf16, #tpu.memory_space<vmem>>, vector<12x64xbf16>
    %c0_4 = arith.constant 0 : index
    %c0_5 = arith.constant 0 : index
    %3 = vector.load %arg4[%c0_4, %c0_5] : memref<1x64xf32, #tpu.memory_space<vmem>>, vector<1x64xf32>
    %cst = arith.constant dense<0.000000e+00> : vector<16x64xf32>
    %4 = tpu.matmul %1, %2, %cst {dimension_numbers = #tpu.dot_dimension_numbers<[1], [0], [0], [1], [0, 0, 1, 1], [], []>} : vector<16x12xbf16>, vector<12x64xbf16>, vector<16x64xf32> -> vector<16x64xf32>
    %5 = vector.broadcast %3 : vector<1x64xf32> to vector<16x64xf32>
    %6 = arith.addf %4, %5 : vector<16x64xf32>
    %cst_6 = arith.constant 0.000000e+00 : f32
    %7 = vector.broadcast %cst_6 : f32 to vector<16x64xf32>
    %8 = arith.maximumf %6, %7 : vector<16x64xf32>
    %9 = arith.truncf %8 : vector<16x64xf32> to vector<16x64xbf16>
    %c0_7 = arith.constant 0 : index
    %c0_8 = arith.constant 0 : index
    %10 = vector.load %arg5[%c0_7, %c0_8] : memref<64x64xbf16, #tpu.memory_space<vmem>>, vector<64x64xbf16>
    %c0_9 = arith.constant 0 : index
    %c0_10 = arith.constant 0 : index
    %11 = vector.load %arg6[%c0_9, %c0_10] : memref<1x64xf32, #tpu.memory_space<vmem>>, vector<1x64xf32>
    %cst_11 = arith.constant dense<0.000000e+00> : vector<16x64xf32>
    %12 = tpu.matmul %9, %10, %cst_11 {dimension_numbers = #tpu.dot_dimension_numbers<[1], [0], [0], [1], [0, 0, 1, 1], [], []>} : vector<16x64xbf16>, vector<64x64xbf16>, vector<16x64xf32> -> vector<16x64xf32>
    %13 = vector.broadcast %11 : vector<1x64xf32> to vector<16x64xf32>
    %14 = arith.addf %12, %13 : vector<16x64xf32>
    %cst_12 = arith.constant 0.000000e+00 : f32
    %15 = vector.broadcast %cst_12 : f32 to vector<16x64xf32>
    %16 = arith.maximumf %14, %15 : vector<16x64xf32>
    %17 = arith.truncf %16 : vector<16x64xf32> to vector<16x64xbf16>
    %c0_13 = arith.constant 0 : index
    %c0_14 = arith.constant 0 : index
    %18 = vector.load %arg7[%c0_13, %c0_14] : memref<64x64xbf16, #tpu.memory_space<vmem>>, vector<64x64xbf16>
    %c0_15 = arith.constant 0 : index
    %c0_16 = arith.constant 0 : index
    %19 = vector.load %arg8[%c0_15, %c0_16] : memref<1x64xf32, #tpu.memory_space<vmem>>, vector<1x64xf32>
    %cst_17 = arith.constant dense<0.000000e+00> : vector<16x64xf32>
    %20 = tpu.matmul %17, %18, %cst_17 {dimension_numbers = #tpu.dot_dimension_numbers<[1], [0], [0], [1], [0, 0, 1, 1], [], []>} : vector<16x64xbf16>, vector<64x64xbf16>, vector<16x64xf32> -> vector<16x64xf32>
    %21 = vector.broadcast %19 : vector<1x64xf32> to vector<16x64xf32>
    %22 = arith.addf %20, %21 : vector<16x64xf32>
    %cst_18 = arith.constant 0.000000e+00 : f32
    %23 = vector.broadcast %cst_18 : f32 to vector<16x64xf32>
    %24 = arith.maximumf %22, %23 : vector<16x64xf32>
    %25 = arith.truncf %24 : vector<16x64xf32> to vector<16x64xbf16>
    %c0_19 = arith.constant 0 : index
    %c0_20 = arith.constant 0 : index
    %c0_21 = arith.constant 0 : index
    %26 = vector.load %arg9[%c0_19, %c0_20, %c0_21] : memref<1x16x64xbf16, #tpu.memory_space<vmem>>, vector<1x16x64xbf16>
    %27 = vector.shape_cast %26 : vector<1x16x64xbf16> to vector<16x64xbf16>
    %28 = vector.shape_cast %25 : vector<16x64xbf16> to vector<1x16x64xbf16>
    tpu.vector_store %arg9[%c0_19, %c0_20, %c0_21], %28 {strides = array<i32>} : memref<1x16x64xbf16, #tpu.memory_space<vmem>>, vector<1x16x64xbf16>,
    return
  }
  func.func @transform_0(%arg0: i32, %arg1: i32) -> (i32, i32, i32) {
    %c0_i32 = arith.constant 0 : i32
    %c0_i32_0 = arith.constant 0 : i32
    return %arg0, %arg1, %c0_i32 : i32, i32, i32
  }
  func.func @transform_1(%arg0: i32, %arg1: i32) -> (i32, i32) {
    %c0_i32 = arith.constant 0 : i32
    %c0_i32_0 = arith.constant 0 : i32
    %c0_i32_1 = arith.constant 0 : i32
    return %c0_i32, %c0_i32_0 : i32, i32
  }
  func.func @transform_2(%arg0: i32, %arg1: i32) -> (i32, i32) {
    %c0_i32 = arith.constant 0 : i32
    %c0_i32_0 = arith.constant 0 : i32
    %c0_i32_1 = arith.constant 0 : i32
    return %c0_i32, %c0_i32_0 : i32, i32
  }
  func.func @transform_3(%arg0: i32, %arg1: i32) -> (i32, i32) {
    %c0_i32 = arith.constant 0 : i32
    %c0_i32_0 = arith.constant 0 : i32
    %c0_i32_1 = arith.constant 0 : i32
    return %c0_i32, %c0_i32_0 : i32, i32
  }
  func.func @transform_4(%arg0: i32, %arg1: i32) -> (i32, i32) {
    %c0_i32 = arith.constant 0 : i32
    %c0_i32_0 = arith.constant 0 : i32
    %c0_i32_1 = arith.constant 0 : i32
    return %c0_i32, %c0_i32_0 : i32, i32
  }
  func.func @transform_5(%arg0: i32, %arg1: i32) -> (i32, i32) {
    %c0_i32 = arith.constant 0 : i32
    %c0_i32_0 = arith.constant 0 : i32
    %c0_i32_1 = arith.constant 0 : i32
    return %c0_i32, %c0_i32_0 : i32, i32
  }
  func.func @transform_6(%arg0: i32, %arg1: i32) -> (i32, i32) {
    %c0_i32 = arith.constant 0 : i32
    %c0_i32_0 = arith.constant 0 : i32
    %c0_i32_1 = arith.constant 0 : i32
    return %c0_i32, %c0_i32_0 : i32, i32
  }
  func.func @transform_7(%arg0: i32, %arg1: i32) -> (i32, i32, i32) {
    %c0_i32 = arith.constant 0 : i32
    %c0_i32_0 = arith.constant 0 : i32
    return %arg0, %arg1, %c0_i32 : i32, i32, i32
  }
}

module attributes {stable_mosaic.version = 11 : i64} {
  func.func @kernel(%arg0: i32, %arg1: i32, %arg2: memref<1x16x64xbf16, #tpu.memory_space<vmem>>, %arg3: memref<64x128xbf16, #tpu.memory_space<vmem>>, %arg4: memref<1x128xf32, #tpu.memory_space<vmem>>, %arg5: memref<1x16x128xbf16, #tpu.memory_space<vmem>>) attributes {dimension_semantics = [#tpu.dimension_semantics<parallel>, #tpu.dimension_semantics<parallel>], iteration_bounds = array<i64: 2, 1>, scalar_prefetch = 0 : i64, scratch_operands = 0 : i64, tpu.core_type = #tpu.core_type<tc>, window_params = [{transform_indices = @transform_0, window_bounds = array<i64: 1, 16, 64>}, {pipeline_mode = #tpu.pipeline_mode<synchronous>, transform_indices = @transform_1, window_bounds = array<i64: 64, 128>}, {pipeline_mode = #tpu.pipeline_mode<synchronous>, transform_indices = @transform_2, window_bounds = array<i64: 1, 128>}, {transform_indices = @transform_3, window_bounds = array<i64: 1, 16, 128>}]} {
    %c0 = arith.constant 0 : index
    %c0_0 = arith.constant 0 : index
    %c0_1 = arith.constant 0 : index
    %0 = vector.load %arg2[%c0, %c0_0, %c0_1] : memref<1x16x64xbf16, #tpu.memory_space<vmem>>, vector<1x16x64xbf16>
    %1 = vector.shape_cast %0 : vector<1x16x64xbf16> to vector<16x64xbf16>
    %c0_2 = arith.constant 0 : index
    %c0_3 = arith.constant 0 : index
    %2 = vector.load %arg3[%c0_2, %c0_3] : memref<64x128xbf16, #tpu.memory_space<vmem>>, vector<64x128xbf16>
    %c0_4 = arith.constant 0 : index
    %c0_5 = arith.constant 0 : index
    %3 = vector.load %arg4[%c0_4, %c0_5] : memref<1x128xf32, #tpu.memory_space<vmem>>, vector<1x128xf32>
    %cst = arith.constant dense<0.000000e+00> : vector<16x128xf32>
    %4 = tpu.matmul %1, %2, %cst {dimension_numbers = #tpu.dot_dimension_numbers<[1], [0], [0], [1], [0, 0, 1, 1], [], []>} : vector<16x64xbf16>, vector<64x128xbf16>, vector<16x128xf32> -> vector<16x128xf32>
    %5 = vector.broadcast %3 : vector<1x128xf32> to vector<16x128xf32>
    %6 = arith.addf %4, %5 : vector<16x128xf32>
    %cst_6 = arith.constant 0.000000e+00 : f32
    %7 = vector.broadcast %cst_6 : f32 to vector<16x128xf32>
    %8 = arith.maximumf %6, %7 : vector<16x128xf32>
    %9 = arith.truncf %8 : vector<16x128xf32> to vector<16x128xbf16>
    %c0_7 = arith.constant 0 : index
    %c0_8 = arith.constant 0 : index
    %c0_9 = arith.constant 0 : index
    %10 = vector.load %arg5[%c0_7, %c0_8, %c0_9] : memref<1x16x128xbf16, #tpu.memory_space<vmem>>, vector<1x16x128xbf16>
    %11 = vector.shape_cast %10 : vector<1x16x128xbf16> to vector<16x128xbf16>
    %12 = vector.shape_cast %9 : vector<16x128xbf16> to vector<1x16x128xbf16>
    tpu.vector_store %arg5[%c0_7, %c0_8, %c0_9], %12 {strides = array<i32>} : memref<1x16x128xbf16, #tpu.memory_space<vmem>>, vector<1x16x128xbf16>,
    return
  }
  func.func @transform_0(%arg0: i32, %arg1: i32) -> (i32, i32, i32) {
    %c0_i32 = arith.constant 0 : i32
    %c0_i32_0 = arith.constant 0 : i32
    return %arg0, %arg1, %c0_i32 : i32, i32, i32
  }
  func.func @transform_1(%arg0: i32, %arg1: i32) -> (i32, i32) {
    %c0_i32 = arith.constant 0 : i32
    %c0_i32_0 = arith.constant 0 : i32
    %c0_i32_1 = arith.constant 0 : i32
    return %c0_i32, %c0_i32_0 : i32, i32
  }
  func.func @transform_2(%arg0: i32, %arg1: i32) -> (i32, i32) {
    %c0_i32 = arith.constant 0 : i32
    %c0_i32_0 = arith.constant 0 : i32
    %c0_i32_1 = arith.constant 0 : i32
    return %c0_i32, %c0_i32_0 : i32, i32
  }
  func.func @transform_3(%arg0: i32, %arg1: i32) -> (i32, i32, i32) {
    %c0_i32 = arith.constant 0 : i32
    %c0_i32_0 = arith.constant 0 : i32
    return %arg0, %arg1, %c0_i32 : i32, i32, i32
  }
}

module attributes {stable_mosaic.version = 11 : i64} {
  func.func @kernel(%arg0: i32, %arg1: i32, %arg2: i32, %arg3: memref<1x16x128xbf16, #tpu.memory_space<vmem>>, %arg4: memref<128x256xbf16, #tpu.memory_space<vmem>>, %arg5: memref<1x256xf32, #tpu.memory_space<vmem>>, %arg6: memref<1x1x256xf32, #tpu.memory_space<vmem>>) attributes {dimension_semantics = [#tpu.dimension_semantics<parallel>, #tpu.dimension_semantics<parallel>, #tpu.dimension_semantics<arbitrary>], iteration_bounds = array<i64: 2, 4, 1>, scalar_prefetch = 0 : i64, scratch_operands = 0 : i64, tpu.core_type = #tpu.core_type<tc>, window_params = [{transform_indices = @transform_0, window_bounds = array<i64: 1, 16, 128>}, {transform_indices = @transform_1, window_bounds = array<i64: 128, 256>}, {transform_indices = @transform_2, window_bounds = array<i64: 1, 256>}, {transform_indices = @transform_3, window_bounds = array<i64: 1, 1, 256>}]} {
    %c0_i32 = arith.constant 0 : i32
    %0 = arith.cmpi eq, %arg2, %c0_i32 : i32
    %1 = arith.extui %0 : i1 to i32
    %c0_i32_0 = arith.constant 0 : i32
    %2 = arith.cmpi ne, %1, %c0_i32_0 : i32
    scf.if %2 {
      %cst_14 = arith.constant 0xFF800000 : f32
      %18 = vector.broadcast %cst_14 : f32 to vector<1x1x256xf32>
      %c0_15 = arith.constant 0 : index
      %c0_16 = arith.constant 0 : index
      %c0_17 = arith.constant 0 : index
      %19 = vector.load %arg6[%c0_15, %c0_16, %c0_17] : memref<1x1x256xf32, #tpu.memory_space<vmem>>, vector<1x1x256xf32>
      tpu.vector_store %arg6[%c0_15, %c0_16, %c0_17], %18 {strides = array<i32>} : memref<1x1x256xf32, #tpu.memory_space<vmem>>, vector<1x1x256xf32>,
    } else {
    }
    %c0 = arith.constant 0 : index
    %c0_1 = arith.constant 0 : index
    %3 = vector.load %arg4[%c0, %c0_1] : memref<128x256xbf16, #tpu.memory_space<vmem>>, vector<128x256xbf16>
    %c0_2 = arith.constant 0 : index
    %c0_3 = arith.constant 0 : index
    %c0_4 = arith.constant 0 : index
    %4 = vector.load %arg6[%c0_2, %c0_3, %c0_4] : memref<1x1x256xf32, #tpu.memory_space<vmem>>, vector<1x1x256xf32>
    %5 = vector.shape_cast %4 : vector<1x1x256xf32> to vector<1x256xf32>
    %c0_5 = arith.constant 0 : index
    %c0_6 = arith.constant 0 : index
    %c0_7 = arith.constant 0 : index
    %6 = vector.load %arg3[%c0_5, %c0_6, %c0_7] : memref<1x16x128xbf16, #tpu.memory_space<vmem>>, vector<1x16x128xbf16>
    %7 = vector.shape_cast %6 : vector<1x16x128xbf16> to vector<16x128xbf16>
    %cst = arith.constant dense<0.000000e+00> : vector<16x256xf32>
    %8 = tpu.matmul %7, %3, %cst {dimension_numbers = #tpu.dot_dimension_numbers<[1], [0], [0], [1], [0, 0, 1, 1], [], []>} : vector<16x128xbf16>, vector<128x256xbf16>, vector<16x256xf32> -> vector<16x256xf32>
    %cst_8 = arith.constant dense<0xFF800000> : vector<256xf32>
    %9 = vector.multi_reduction <maximumf>, %8, %cst_8 [0] : vector<16x256xf32> to vector<256xf32>
    %10 = vector.shape_cast %9 : vector<256xf32> to vector<1x256xf32>
    %11 = arith.maximumf %5, %10 : vector<1x256xf32>
    %c0_9 = arith.constant 0 : index
    %c0_10 = arith.constant 0 : index
    %c0_11 = arith.constant 0 : index
    %12 = vector.load %arg6[%c0_9, %c0_10, %c0_11] : memref<1x1x256xf32, #tpu.memory_space<vmem>>, vector<1x1x256xf32>
    %13 = vector.shape_cast %12 : vector<1x1x256xf32> to vector<1x256xf32>
    %14 = vector.shape_cast %11 : vector<1x256xf32> to vector<1x1x256xf32>
    tpu.vector_store %arg6[%c0_9, %c0_10, %c0_11], %14 {strides = array<i32>} : memref<1x1x256xf32, #tpu.memory_space<vmem>>, vector<1x1x256xf32>,
    %c0_i32_12 = arith.constant 0 : i32
    %15 = arith.cmpi eq, %arg2, %c0_i32_12 : i32
    %16 = arith.extui %15 : i1 to i32
    %c0_i32_13 = arith.constant 0 : i32
    %17 = arith.cmpi ne, %16, %c0_i32_13 : i32
    scf.if %17 {
      %c0_14 = arith.constant 0 : index
      %c0_15 = arith.constant 0 : index
      %c0_16 = arith.constant 0 : index
      %18 = vector.load %arg6[%c0_14, %c0_15, %c0_16] : memref<1x1x256xf32, #tpu.memory_space<vmem>>, vector<1x1x256xf32>
      %19 = vector.shape_cast %18 : vector<1x1x256xf32> to vector<1x256xf32>
      %c0_17 = arith.constant 0 : index
      %c0_18 = arith.constant 0 : index
      %20 = vector.load %arg5[%c0_17, %c0_18] : memref<1x256xf32, #tpu.memory_space<vmem>>, vector<1x256xf32>
      %21 = arith.addf %19, %20 : vector<1x256xf32>
      %c0_19 = arith.constant 0 : index
      %c0_20 = arith.constant 0 : index
      %c0_21 = arith.constant 0 : index
      %22 = vector.load %arg6[%c0_19, %c0_20, %c0_21] : memref<1x1x256xf32, #tpu.memory_space<vmem>>, vector<1x1x256xf32>
      %23 = vector.shape_cast %22 : vector<1x1x256xf32> to vector<1x256xf32>
      %24 = vector.shape_cast %21 : vector<1x256xf32> to vector<1x1x256xf32>
      tpu.vector_store %arg6[%c0_19, %c0_20, %c0_21], %24 {strides = array<i32>} : memref<1x1x256xf32, #tpu.memory_space<vmem>>, vector<1x1x256xf32>,
    } else {
    }
    return
  }
  func.func @transform_0(%arg0: i32, %arg1: i32, %arg2: i32) -> (i32, i32, i32) {
    %c0_i32 = arith.constant 0 : i32
    %c0_i32_0 = arith.constant 0 : i32
    return %arg0, %arg2, %c0_i32 : i32, i32, i32
  }
  func.func @transform_1(%arg0: i32, %arg1: i32, %arg2: i32) -> (i32, i32) {
    %c0_i32 = arith.constant 0 : i32
    %c0_i32_0 = arith.constant 0 : i32
    return %c0_i32, %arg1 : i32, i32
  }
  func.func @transform_2(%arg0: i32, %arg1: i32, %arg2: i32) -> (i32, i32) {
    %c0_i32 = arith.constant 0 : i32
    %c0_i32_0 = arith.constant 0 : i32
    return %c0_i32, %arg1 : i32, i32
  }
  func.func @transform_3(%arg0: i32, %arg1: i32, %arg2: i32) -> (i32, i32, i32) {
    %c0_i32 = arith.constant 0 : i32
    %c0_i32_0 = arith.constant 0 : i32
    return %arg0, %c0_i32, %arg1 : i32, i32, i32
  }
}

</mosaic_0001>

<bundles_post_ra>
// kernel: foldnet_encoder_forward.4
= control target key start
LH: loop header
LB: loop body
LE: loop exit
PB: predicated region body
PF: predicated region fallthrough
CT: control target
= control target key end

     0   :  { %s674_s12 = smov 0   ;;  %s676_s13 = smov 0   ;;  %s770_s0 = inlined_call_operand.vmem [shape: f32[2,16,3], index: 0, kind: input, shape index: {}]   ;;  %s771_s1 = inlined_call_operand.vmem [shape: f32[2,3,16], index: 1, kind: input, shape index: {}]   ;;  %s772_s2 = inlined_call_operand.vmem [shape: f32[2,1,16], index: 2, kind: input, shape index: {}]   ;;  %s773_s3 = inlined_call_operand.vmem [shape: s32[2,16,4], index: 3, kind: output, shape index: {}]  }
   0x1   :  { %s678_s14 = smov 0  }
   0x2 LB: > { %s25_s15 = sadd.s32 1, %s643_s13  ;;  %p538_p0 = scmp.ge.s32.totalorder %s647_s14, 1  ;;  %s647_s14 = sphi %s678_s14, %s13_s14   ;;  %s643_s13 = sphi %s676_s13, %s775_s13   ;;  %s639_s12 = sphi %s674_s12, %s774_s12  }
   0x3   : > { %p27_p1 = scmp.ge.s32.totalorder %s25_s15, 2  ;;  %p175_p2 = scmp.lt.s32.totalorder %s647_s14, 3 }
   0x5   : > { %s777_s15 = smov (%p27_p1, %s25_s15), 0  ;;  %p176_p3 = pnand %p538_p0, %p175_p2 }
   0x6   : > { %p215_p4 = scmp.lt.s32.totalorder (!%p176_p3), %s639_s12, 1  ;;  %s651_s20 = smov (!%p176_p3), 127  }
   0x7   : > { %179 = sbr.rel (%p176_p3) target bundleno = 1236 (0x4d4), region = 32  ;;  %s652_s21 = smov (!%p176_p3), 126  }
   0xc   : > { %v649_v0 = vmov 1   ;;  %v650_v1 = vmov 0   ;;  %s779_s12 = smov (!%p215_p4, %s639_s12), 1  ;;  %v653_v6 = vmov 2   ;;  %vm326_vm0 = vcmask 130048  }
   0xd   : > { %618 = vset.pattern.permute.xlu0 %v649_v0  ;;  %617 = vset.pattern.permute.xlu2 %v650_v1  ;;  %s546_s16 = sshll.u32 %s779_s12, 4  ;;  %s230_s24 = scalar_lea.vmem %s772_s2, %s779_s12  ;;  %v323_v46 = vlaneseq }
   0xe   : > { %619 = vset.pattern.permute.xlu1 %v649_v0  ;;  %s222_s19 = scalar_lea.vmem %s770_s0, %s546_s16  ;;  %s541_s25 = sshll.u32 %s779_s12, 2  ;;  %v624_v29 = vld [vmem:[%s230_s24] ss:$0 sm:$0xff] }
   0xf   : > { %v241_v2 = vld [vmem:[%s222_s19] sm:$0xff]  ;;  %v242_v4 = vld [vmem:[%s222_s19 + $0x8] sm:$0xff]  ;;  %s227_s28 = scalar_lea.vmem %s771_s1, %s541_s25  ;;  %v715_v47 = vand.u32 127, %v323_v46  ;;  %s239_s6 = scalar_lea.vmem %s773_s3, %s546_s16 }
  0x10   : > { %v284_v3 = vmul.f32 %v241_v2, %v241_v2  ;;  %247 = vperm.xlu2 %617, %v241_v2   ;;  %v285_v5 = vmul.f32 %v242_v4, %v242_v4  ;;  %v243_v16 = vld [vmem:[%s227_s28] sm:$0x7] }
  0x11   : > { %v255_v18 = vperm.slane %v243_v16, 0  ;;  %v266_v19 = vperm.slane %v243_v16, 1  ;;  %v279_v22 = vperm.slane %v243_v16, 2  ;;  %v718_v48 = vcvt.s32.f32 %v715_v47 }
  0x12   : > { %288 = vrot.lane.b32.xlu0 %v284_v3, %s651_s20  ;;  %296 = vrot.lane.b32.xlu1 %v284_v3, %s652_s21  ;;  %vm345_vm10 = vcmp.eq.s32.totalorder %v715_v47, 0  ;;  %vm370_vm11 = vcmp.eq.s32.totalorder %v715_v47, 1 }
  0x18   : > { %252 = vperm.xlu2 %617, %v242_v4  }
  0x1a   : > { %290 = vrot.lane.b32.xlu0 %v285_v5, %s651_s20  ;;  %298 = vrot.lane.b32.xlu1 %v285_v5, %s652_s21 }
  0x20   : > { %620 = vset.pattern.permute.xlu2 %v653_v6 }
  0x21   : > { %272 = vperm.xlu2 %620, %v241_v2  }
  0x22   : > { %259 = vperm.xlu0 %618, %v241_v2   ;;  %263 = vperm.xlu1 %619, %v242_v4  }
  0x29   : > { %622 = vset.pattern.permute.xlu2 %v650_v1 }
  0x2a   : > { %621 = vset.pattern.permute.xlu1 %v653_v6  ;;  %623 = vset.pattern.permute.xlu0 %v650_v1 }
  0x2b   : > { %276 = vperm.xlu1 %621, %v242_v4  }
  0x6a   : > { %v248_v15 = vpop.permute.xlu2 %247 }
  0x6b   : > { %v256_v21 = vmul.f32 %v255_v18, %v248_v15 }
  0x72   : > { %v253_v17 = vpop.permute.xlu2 %252 }
  0x73   : > { %v257_v35 = vmul.f32 %v255_v18, %v253_v17 }
  0x7b   : > { %v273_v24 = vpop.permute.xlu2 %272 }
  0x7c   : > { %v280_v25 = vmul.f32 %v279_v22, %v273_v24 }
  0x84   : > { %v289_v7 = vpop.permute.xlu0 %288  ;;  %v297_v8 = vpop.permute.xlu1 %296 }
  0x85   : > { %v294_v9 = vadd.f32 %v289_v7, %v284_v3 }
  0x87   : > { %v302_v10 = vadd.f32 %v297_v8, %v294_v9 }
  0x89   : > { %308 = vperm.xlu2 %622, %v302_v10  }
  0x8c   : > { %v291_v11 = vpop.permute.xlu0 %290  ;;  %v299_v12 = vpop.permute.xlu1 %298 }
  0x8d   : > { %v295_v13 = vadd.f32 %v291_v11, %v285_v5 }
  0x8f   : > { %v303_v14 = vadd.f32 %v299_v12, %v295_v13 }
  0x91   : > { %313 = vperm.xlu0 %623, %v303_v14  }
  0x94   : > { %v260_v20 = vpop.permute.xlu0 %259  ;;  %v264_v34 = vpop.permute.xlu1 %263 }
  0x95   : > { %v267_v23 = vmul.f32 %v266_v19, %v260_v20  ;;  %v268_v36 = vmul.f32 %v266_v19, %v264_v34 }
  0x97   : > { %v269_v26 = vadd.f32 %v267_v23, %v256_v21  ;;  %v270_v38 = vadd.f32 %v268_v36, %v257_v35 }
  0x99   : > { %v282_v27 = vadd.f32 %v280_v25, %v269_v26 }
  0x9b   : > { %v304_v28 = vmul.f32 2.0, %v282_v27 }
  0x9d   : > { %v277_v37 = vpop.permute.xlu1 %276 }
  0x9e   : > { %v281_v39 = vmul.f32 %v279_v22, %v277_v37 }
  0xa0   : > { %v283_v40 = vadd.f32 %v281_v39, %v270_v38 }
  0xa2   : > { %v305_v41 = vmul.f32 2.0, %v283_v40 }
  0xe3   : > { %v309_v30 = vpop.permute.xlu2 %308 }
  0xe4   : > { %v316_v31 = vsub.f32 %v304_v28, %v309_v30 }
  0xe6   : > { %v321_v32 = vsub.f32 %v316_v31, %v624_v29 }
  0xe8   : > { %v327_v33 = vsel %vm326_vm0, %v321_v32, -inf }
  0xe9   : > { %328 = vmax.xlane.f32.xlu1 %v327_v33 }
 0x103   : > { %v314_v42 = vpop.permute.xlu0 %313 }
 0x104   : > { %v317_v43 = vsub.f32 %v305_v41, %v314_v42 }
 0x106   : > { %v322_v44 = vsub.f32 %v317_v43, %v624_v29 }
 0x108   : > { %v330_v45 = vsel %vm326_vm0, %v322_v44, -inf }
 0x109   : > { %331 = vmax.xlane.f32.xlu2 %v330_v45 }
 0x15c   : > { %v329_v49 = vpop.xlane.xlu1 %328 }
 0x15d   : > { %vm333_vm1 = vcmp.ge.f32.partialorder %v321_v32, %v329_v49 }
 0x15e   : > { %v335_v50 = vsel %vm333_vm1, %v718_v48, 16.0 }
 0x15f   : > { %v337_v51 = vsel %vm326_vm0, %v335_v50, inf }
 0x160   : > { %338 = vmin.xlane.f32.xlu0 %v337_v51 }
 0x17c   : > { %v332_v52 = vpop.xlane.xlu2 %331 }
 0x17d   : > { %vm334_vm2 = vcmp.ge.f32.partialorder %v322_v44, %v332_v52 }
 0x17e   : > { %v336_v53 = vsel %vm334_vm2, %v718_v48, 16.0 }
 0x17f   : > { %v340_v54 = vsel %vm326_vm0, %v336_v53, inf }
 0x180   : > { %341 = vmin.xlane.f32.xlu2 %v340_v54 }
 0x1d3   : > { %v339_v55 = vpop.xlane.xlu0 %338 }
 0x1d4   : > { %vm548_vm3 = vcmp.lt.s32.totalorder %v339_v55, 0  ;;  %v549_v56 = vceil.f32 %v339_v55  ;;  %v550_v57 = vfloor.f32 %v339_v55 }
 0x1d6   : > { %v551_v58 = vsel %vm548_vm3, %v549_v56, %v550_v57  ;;  %vm395_vm3 = vcmp.eq.s32.totalorder %v715_v47, 2 }
 0x1d7   : > { %v552_v59 = vcvt.f32.s32 %v551_v58 }
 0x1d9   : > { %vm348_vm4 = vcmp.eq.s32.totalorder %v715_v47, %v552_v59  ;;  %v346_v16 = vsel %vm345_vm10, %v552_v59, 0 }
 0x1da   : > { %v350_v60 = vsel %vm348_vm4, -inf, %v321_v32 }
 0x1db   : > { %v352_v61 = vsel %vm326_vm0, %v350_v60, -inf }
 0x1dc   : > { %353 = vmax.xlane.f32.xlu1 %v352_v61 }
 0x1f3   : > { %v342_v62 = vpop.xlane.xlu2 %341 }
 0x1f4   : > { %vm553_vm5 = vcmp.lt.s32.totalorder %v342_v62, 0  ;;  %v554_v63 = vceil.f32 %v342_v62  ;;  %v555_v0 = vfloor.f32 %v342_v62 }
 0x1f6   : > { %v556_v1 = vsel %vm553_vm5, %v554_v63, %v555_v0 }
 0x1f7   : > { %v557_v2 = vcvt.f32.s32 %v556_v1 }
 0x1f9   : > { %vm349_vm6 = vcmp.eq.s32.totalorder %v715_v47, %v557_v2  ;;  %v347_v25 = vsel %vm345_vm10, %v557_v2, 0  ;;  %vm420_vm10 = vcmp.eq.s32.totalorder %v715_v47, 3 }
 0x1fa   : > { %v351_v3 = vsel %vm349_vm6, -inf, %v322_v44 }
 0x1fb   : > { %v355_v4 = vsel %vm326_vm0, %v351_v3, -inf }
 0x1fc   : > { %356 = vmax.xlane.f32.xlu2 %v355_v4 }
 0x24f   : > { %v354_v5 = vpop.xlane.xlu1 %353 }
 0x250   : > { %vm358_vm7 = vcmp.ge.f32.partialorder %v350_v60, %v354_v5 }
 0x251   : > { %v360_v6 = vsel %vm358_vm7, %v718_v48, 16.0 }
 0x252   : > { %v362_v7 = vsel %vm326_vm0, %v360_v6, inf }
 0x253   : > { %363 = vmin.xlane.f32.xlu1 %v362_v7 }
 0x26f   : > { %v357_v8 = vpop.xlane.xlu2 %356 }
 0x270   : > { %vm359_vm8 = vcmp.ge.f32.partialorder %v351_v3, %v357_v8 }
 0x271   : > { %v361_v9 = vsel %vm359_vm8, %v718_v48, 16.0 }
 0x272   : > { %v365_v10 = vsel %vm326_vm0, %v361_v9, inf }
 0x273   : > { %366 = vmin.xlane.f32.xlu2 %v365_v10 }
 0x2c6   : > { %v364_v11 = vpop.xlane.xlu1 %363 }
 0x2c7   : > { %vm558_vm9 = vcmp.lt.s32.totalorder %v364_v11, 0  ;;  %v559_v12 = vceil.f32 %v364_v11  ;;  %v560_v13 = vfloor.f32 %v364_v11 }
 0x2c9   : > { %v561_v14 = vsel %vm558_vm9, %v559_v12, %v560_v13 }
 0x2ca   : > { %v562_v15 = vcvt.f32.s32 %v561_v14 }
 0x2cc   : > { %vm373_vm12 = vcmp.eq.s32.totalorder %v715_v47, %v562_v15  ;;  %v371_v17 = vsel %vm370_vm11, %v562_v15, %v346_v16 }
 0x2cd   : > { %v375_v18 = vsel %vm373_vm12, -inf, %v350_v60 }
 0x2ce   : > { %v377_v19 = vsel %vm326_vm0, %v375_v18, -inf }
 0x2cf   : > { %378 = vmax.xlane.f32.xlu0 %v377_v19 }
 0x2e6   : > { %v367_v20 = vpop.xlane.xlu2 %366 }
 0x2e7   : > { %vm563_vm13 = vcmp.lt.s32.totalorder %v367_v20, 0  ;;  %v564_v21 = vceil.f32 %v367_v20  ;;  %v565_v22 = vfloor.f32 %v367_v20 }
 0x2e9   : > { %v566_v23 = vsel %vm563_vm13, %v564_v21, %v565_v22 }
 0x2ea   : > { %v567_v24 = vcvt.f32.s32 %v566_v23 }
 0x2ec   : > { %v372_v26 = vsel %vm370_vm11, %v567_v24, %v347_v25  ;;  %vm374_vm14 = vcmp.eq.s32.totalorder %v715_v47, %v567_v24  ;;  %vm423_vm11 = vcmask 31744  }
 0x2ed   : > { %v376_v27 = vsel %vm374_vm14, -inf, %v351_v3 }
 0x2ee   : > { %v380_v28 = vsel %vm326_vm0, %v376_v27, -inf }
 0x2ef   : > { %381 = vmax.xlane.f32.xlu1 %v380_v28 }
 0x342   : > { %v379_v29 = vpop.xlane.xlu0 %378 }
 0x343   : > { %vm383_vm15 = vcmp.ge.f32.partialorder %v375_v18, %v379_v29 }
 0x344   : > { %v385_v30 = vsel %vm383_vm15, %v718_v48, 16.0 }
 0x345   : > { %v387_v31 = vsel %vm326_vm0, %v385_v30, inf }
 0x346   : > { %388 = vmin.xlane.f32.xlu2 %v387_v31 }
 0x362   : > { %v382_v32 = vpop.xlane.xlu1 %381 }
 0x363   : > { %vm384_vm1 = vcmp.ge.f32.partialorder %v376_v27, %v382_v32 }
 0x364   : > { %v386_v33 = vsel %vm384_vm1, %v718_v48, 16.0 }
 0x365   : > { %v390_v34 = vsel %vm326_vm0, %v386_v33, inf }
 0x366   : > { %391 = vmin.xlane.f32.xlu0 %v390_v34 }
 0x3b9   : > { %v389_v35 = vpop.xlane.xlu2 %388 }
 0x3ba   : > { %vm568_vm2 = vcmp.lt.s32.totalorder %v389_v35, 0  ;;  %v569_v36 = vceil.f32 %v389_v35  ;;  %v570_v37 = vfloor.f32 %v389_v35 }
 0x3bc   : > { %v571_v38 = vsel %vm568_vm2, %v569_v36, %v570_v37 }
 0x3bd   : > { %v572_v39 = vcvt.f32.s32 %v571_v38 }
 0x3bf   : > { %vm398_vm4 = vcmp.eq.s32.totalorder %v715_v47, %v572_v39  ;;  %v396_v40 = vsel %vm395_vm3, %v572_v39, %v371_v17 }
 0x3c0   : > { %v400_v41 = vsel %vm398_vm4, -inf, %v375_v18 }
 0x3c1   : > { %v402_v42 = vsel %vm326_vm0, %v400_v41, -inf }
 0x3c2   : > { %403 = vmax.xlane.f32.xlu1 %v402_v42 }
 0x3d9   : > { %v392_v43 = vpop.xlane.xlu0 %391 }
 0x3da   : > { %vm573_vm5 = vcmp.lt.s32.totalorder %v392_v43, 0  ;;  %v574_v44 = vceil.f32 %v392_v43  ;;  %v575_v45 = vfloor.f32 %v392_v43 }
 0x3dc   : > { %v576_v46 = vsel %vm573_vm5, %v574_v44, %v575_v45 }
 0x3dd   : > { %v577_v49 = vcvt.f32.s32 %v576_v46 }
 0x3df   : > { %vm399_vm6 = vcmp.eq.s32.totalorder %v715_v47, %v577_v49  ;;  %v397_v50 = vsel %vm395_vm3, %v577_v49, %v372_v26 }
 0x3e0   : > { %v401_v51 = vsel %vm399_vm6, -inf, %v376_v27 }
 0x3e1   : > { %v405_v52 = vsel %vm326_vm0, %v401_v51, -inf }
 0x3e2   : > { %406 = vmax.xlane.f32.xlu2 %v405_v52 }
 0x435   : > { %v404_v53 = vpop.xlane.xlu1 %403 }
 0x436   : > { %vm408_vm7 = vcmp.ge.f32.partialorder %v400_v41, %v404_v53 }
 0x437   : > { %v410_v54 = vsel %vm408_vm7, %v718_v48, 16.0 }
 0x438   : > { %v412_v55 = vsel %vm326_vm0, %v410_v54, inf }
 0x439   : > { %413 = vmin.xlane.f32.xlu0 %v412_v55 }
 0x455   : > { %v407_v56 = vpop.xlane.xlu2 %406 }
 0x456   : > { %vm409_vm8 = vcmp.ge.f32.partialorder %v401_v51, %v407_v56 }
 0x457   : > { %v411_v57 = vsel %vm409_vm8, %v718_v48, 16.0 }
 0x458   : > { %v415_v58 = vsel %vm326_vm0, %v411_v57, inf }
 0x459   : > { %416 = vmin.xlane.f32.xlu1 %v415_v58 }
 0x4ac   : > { %v414_v59 = vpop.xlane.xlu0 %413 }
 0x4ad   : > { %vm578_vm9 = vcmp.lt.s32.totalorder %v414_v59, 0  ;;  %v579_v60 = vceil.f32 %v414_v59  ;;  %v580_v61 = vfloor.f32 %v414_v59 }
 0x4af   : > { %v581_v62 = vsel %vm578_vm9, %v579_v60, %v580_v61 }
 0x4b0   : > { %v582_v63 = vcvt.f32.s32 %v581_v62 }
 0x4b2   : > { %v421_v0 = vsel %vm420_vm10, %v582_v63, %v396_v40 }
 0x4b3   : > { %424 = vst.msk [vmem:[%s239_s6] sm:$0xff] %vm423_vm11, %v421_v0 }
 0x4cc   : > { %v417_v48 = vpop.xlane.xlu1 %416 }
 0x4cd   : > { %vm583_vm12 = vcmp.lt.s32.totalorder %v417_v48, 0  ;;  %v584_v1 = vceil.f32 %v417_v48  ;;  %v585_v2 = vfloor.f32 %v417_v48 }
 0x4cf   : > { %v586_v3 = vsel %vm583_vm12, %v584_v1, %v585_v2 }
 0x4d0   : > { %v587_v4 = vcvt.f32.s32 %v586_v3 }
 0x4d2   : > { %v422_v5 = vsel %vm420_vm10, %v587_v4, %v397_v50 }
 0x4d3   : > { %425 = vst.msk [vmem:[%s239_s6 + $0x8] sm:$0xff] %vm423_vm11, %v422_v5 }
 0x4d4 PF: > { %s13_s14 = sadd.s32 1, %s647_s14   ;;  %s774_s12 = smov %s643_s13 }
 0x4d5   : > { %p10_p5 = scmp.ge.s32.totalorder %s13_s14, 4   ;;  %s775_s13 = smov %s777_s15 }
 0x4d7   :  { %12 = sbr.rel (!%p10_p5) target bundleno = 2 (0x2), region = 68 }

// kernel: foldnet_encoder_forward.5
= control target key start
LH: loop header
LB: loop body
LE: loop exit
PB: predicated region body
PF: predicated region fallthrough
CT: control target
= control target key end

     0   :  { %s723_s24 = smov 0   ;;  %s725_s25 = smov 0   ;;  %s804_s0 = inlined_call_operand.vmem [shape: bf16[2,16,12], index: 0, kind: input, shape index: {}]   ;;  %s805_s1 = inlined_call_operand.vmem [shape: bf16[12,64], index: 1, kind: input, shape index: {}]   ;;  %s806_s2 = inlined_call_operand.vmem [shape: f32[1,64], index: 2, kind: input, shape index: {}]   ;;  %s807_s3 = inlined_call_operand.vmem [shape: bf16[64,64], index: 3, kind: input, shape index: {}]   ;;  %s808_s4 = inlined_call_operand.vmem [shape: f32[1,64], index: 4, kind: input, shape index: {}]   ;;  %s809_s5 = inlined_call_operand.vmem [shape: bf16[64,64], index: 5, kind: input, shape index: {}]   ;;  %s810_s6 = inlined_call_operand.vmem [shape: f32[1,64], index: 6, kind: input, shape index: {}]   ;;  %s811_s7 = inlined_call_operand.vmem [shape: bf16[2,16,64], index: 7, kind: output, shape index: {}]  }
   0x1   :  { %s727_s26 = smov 0  }
   0x2 LB: > { %s29_s27 = sadd.s32 1, %s677_s25  ;;  %p570_p0 = scmp.ge.s32.totalorder %s681_s26, 1  ;;  %s681_s26 = sphi %s727_s26, %s17_s26   ;;  %s677_s25 = sphi %s725_s25, %s813_s25   ;;  %s673_s24 = sphi %s723_s24, %s812_s24  }
   0x3   : > { %p31_p1 = scmp.ge.s32.totalorder %s29_s27, 2  ;;  %p258_p2 = scmp.lt.s32.totalorder %s681_s26, 3 }
   0x5   : > { %s815_s27 = smov (%p31_p1, %s29_s27), 0  ;;  %p259_p3 = pnand %p570_p0, %p258_p2 }
   0x6   : > { %p299_p4 = scmp.lt.s32.totalorder (!%p259_p3), %s673_s24, 1 }
   0x7   : > { %262 = sbr.rel (%p259_p3) target bundleno = 446 (0x1be), region = 48 }
   0xc   : > { %v581_v0 = vld [vmem:[%s805_s1] sm:$0xf]  ;;  %v623_v1 = vld [vmem:[%s805_s1] sm:$0x30]  ;;  %vm341_vm0 = vcmask 1045504   ;;  %s817_s24 = smov (!%p299_p4, %s673_s24), 1 }
   0xd   : > { %v582_v2 = vor.u32 %v623_v1, %v581_v0  ;;  %s620_s9 = sshll.u32 %s817_s24, 3  ;;  %vm337_vm1 = vcmask 97280   ;;  %v627_v5 = vld [vmem:[%s807_s3 + $0x18] sm:$0xff]  ;;  %v626_v6 = vld [vmem:[%s807_s3 + $0x10] sm:$0xff]  ;;  %v625_v7 = vld [vmem:[%s807_s3 + $0x8] sm:$0xff]  ;;  %vm398_vm2 = vcmask 523264  }
   0xe   : > { %s306_s12 = scalar_lea.vmem %s804_s0, %s620_s9  ;;  %406 = vmatpush.bf16.msra.mxu1 %v627_v5  ;;  %v624_v8 = vld [vmem:[%s807_s3] sm:$0xff]  ;;  %v631_v17 = vld [vmem:[%s809_s5 + $0x18] sm:$0xff]  ;;  %v630_v18 = vld [vmem:[%s809_s5 + $0x10] sm:$0xff]  ;;  %s316_s19 = scalar_lea.vmem %s811_s7, %s620_s9  ;;  %vm476_vm3 = vcmask 519168  }
   0xf   : > { %v343_v3 = vsel %vm341_vm0, %v582_v2, 0  ;;  %v622_v4 = vld [vmem:[%s306_s12] sm:$0xff]  ;;  %462 = vmatpush.bf16.msra.mxu2 %v631_v17  ;;  %v629_v19 = vld [vmem:[%s809_s5 + $0x8] sm:$0xff] }
  0x10   : > { %352 = vmatpush.bf16.msra.mxu0 %v343_v3  ;;  %v656_v10 = vld [vmem:[%s806_s2] ss:$0 sm:$0xff] }
  0x11   : > { %v628_v20 = vld [vmem:[%s809_s5] sm:$0xff] }
  0x12   : > { %407 = vmatpush.bf16.msra.mxu1 %v626_v6  ;;  %v657_v22 = vld [vmem:[%s808_s4] ss:$0 sm:$0xff] }
  0x13   : > { %583 = vmatmul.msk.bf16.vlgmr.msra.gmra.mxu0 %vm337_vm1, %v622_v4  ;;  %463 = vmatpush.bf16.msra.mxu2 %v630_v18  ;;  %v658_v29 = vld [vmem:[%s810_s6] ss:$0 sm:$0xff] }
  0x16   : > { %408 = vmatpush.bf16.msra.mxu1 %v625_v7 }
  0x17   : > { %464 = vmatpush.bf16.msra.mxu2 %v629_v19 }
  0x1a   : > { %409 = vmatpush.bf16.msra.mxu1 %v624_v8 }
  0x1b   : > { %465 = vmatpush.bf16.msra.mxu2 %v628_v20 }
  0x90   : > { %v354_v9 = vpop.f32.mrf.mxu0 }
  0x91   : > { %v355_v11 = vadd.f32 %v656_v10, %v354_v9 }
  0x93   : > { %v359_v14 = vmax.f32 %v355_v11, 0.0 }
  0x98   : > { %v356_v12 = vpop.f32.mrf.mxu0 }
  0x99   : > { %v357_v13 = vadd.f32 %v656_v10, %v356_v12 }
  0x9b   : > { %v360_v15 = vmax.f32 %v357_v13, 0.0 }
  0x9d   : > { %v361_v16 = vpack.c.bf16 %v360_v15, %v359_v14 }
  0x9f   : > { %600 = vmatmul.msk.bf16.vlgmr.msra.gmra.mxu1 %vm398_vm2, %v361_v16 }
 0x11c   : > { %v411_v21 = vpop.f32.mrf.mxu1 }
 0x11d   : > { %v412_v23 = vadd.f32 %v657_v22, %v411_v21 }
 0x11f   : > { %v416_v26 = vmax.f32 %v412_v23, 0.0 }
 0x124   : > { %v413_v24 = vpop.f32.mrf.mxu1 }
 0x125   : > { %v414_v25 = vadd.f32 %v657_v22, %v413_v24 }
 0x127   : > { %v417_v27 = vmax.f32 %v414_v25, 0.0 }
 0x129   : > { %v418_v28 = vpack.c.bf16 %v417_v27, %v416_v26 }
 0x12b   : > { %617 = vmatmul.msk.bf16.vlgmr.msra.gmra.mxu2 %vm398_vm2, %v418_v28 }
 0x1ae   : > { %v467_v30 = vpop.f32.mrf.mxu2 }
 0x1af   : > { %v468_v31 = vadd.f32 %v658_v29, %v467_v30 }
 0x1b1   : > { %v472_v32 = vmax.f32 %v468_v31, 0.0 }
 0x1b3   : > { %v474_v33 = vpack.c.bf16 %v472_v32, %v472_v32 }
 0x1b5   : > { %477 = vst.msk [vmem:[%s316_s19] sm:$0xf] %vm476_vm3, %v474_v33 }
 0x1b6   : > { %v469_v34 = vpop.f32.mrf.mxu2 }
 0x1b7   : > { %v470_v35 = vadd.f32 %v658_v29, %v469_v34 }
 0x1b9   : > { %v473_v36 = vmax.f32 %v470_v35, 0.0 }
 0x1bb   : > { %v475_v37 = vpack.c.bf16 %v473_v36, %v473_v36 }
 0x1bd   : > { %478 = vst.msk [vmem:[%s316_s19 + $0x4] sm:$0xf] %vm476_vm3, %v475_v37 }
 0x1be PF: > { %s17_s26 = sadd.s32 1, %s681_s26   ;;  %s812_s24 = smov %s677_s25 }
 0x1bf   : > { %p14_p5 = scmp.ge.s32.totalorder %s17_s26, 4   ;;  %s813_s25 = smov %s815_s27 }
 0x1c1   :  { %16 = sbr.rel (!%p14_p5) target bundleno = 2 (0x2), region = 78 }

// kernel: foldnet_encoder_forward.6
= control target key start
LH: loop header
LB: loop body
LE: loop exit
PB: predicated region body
PF: predicated region fallthrough
CT: control target
= control target key end

     0   :  { %s478_s12 = smov 0   ;;  %s480_s13 = smov 0   ;;  %s526_s0 = inlined_call_operand.vmem [shape: bf16[2,16,64], index: 0, kind: input, shape index: {}]   ;;  %s527_s1 = inlined_call_operand.vmem [shape: bf16[64,128], index: 1, kind: input, shape index: {}]   ;;  %s528_s2 = inlined_call_operand.vmem [shape: f32[1,128], index: 2, kind: input, shape index: {}]   ;;  %s529_s3 = inlined_call_operand.vmem [shape: bf16[2,16,128], index: 3, kind: output, shape index: {}]  }
   0x1   :  { %s482_s14 = smov 0  }
   0x2 LB: > { %s25_s15 = sadd.s32 1, %s452_s13  ;;  %p369_p0 = scmp.ge.s32.totalorder %s456_s14, 1  ;;  %s456_s14 = sphi %s482_s14, %s13_s14   ;;  %s452_s13 = sphi %s480_s13, %s531_s13   ;;  %s448_s12 = sphi %s478_s12, %s530_s12  }
   0x3   : > { %p27_p1 = scmp.ge.s32.totalorder %s25_s15, 2  ;;  %p158_p2 = scmp.lt.s32.totalorder %s456_s14, 3 }
   0x5   : > { %s533_s15 = smov (%p27_p1, %s25_s15), 0  ;;  %p159_p3 = pnand %p369_p0, %p158_p2 }
   0x6   : > { %p191_p4 = scmp.lt.s32.totalorder (!%p159_p3), %s448_s12, 1 }
   0x7   : > { %162 = sbr.rel (%p159_p3) target bundleno = 169 (0xa9), region = 32 }
   0xc   : > { %v403_v0 = vld [vmem:[%s527_s1 + $0x18] sm:$0xff]  ;;  %v402_v1 = vld [vmem:[%s527_s1 + $0x10] sm:$0xff]  ;;  %s535_s12 = smov (!%p191_p4, %s448_s12), 1  ;;  %v401_v2 = vld [vmem:[%s527_s1 + $0x8] sm:$0xff]  ;;  %vm254_vm0 = vcmask 523264  }
   0xd   : > { %262 = vmatpush.bf16.msra.mxu0 %v403_v0  ;;  %s397_s22 = sshll.u32 %s535_s12, 3  ;;  %v400_v3 = vld [vmem:[%s527_s1] sm:$0xff] }
   0xe   : > { %s198_s27 = scalar_lea.vmem %s526_s0, %s397_s22  ;;  %v433_v6 = vld [vmem:[%s528_s2] ss:$0 sm:$0xff]  ;;  %s208_s5 = scalar_lea.vmem %s529_s3, %s397_s22 }
   0xf   : > { %v399_v4 = vld [vmem:[%s198_s27] sm:$0xff] }
  0x11   : > { %263 = vmatpush.bf16.msra.mxu0 %v402_v1 }
  0x15   : > { %264 = vmatpush.bf16.msra.mxu0 %v401_v2 }
  0x19   : > { %265 = vmatpush.bf16.msra.mxu0 %v400_v3 }
  0x1c   : > { %394 = vmatmul.msk.bf16.vlgmr.msra.gmra.mxu0 %vm254_vm0, %v399_v4 }
  0x99   : > { %v267_v5 = vpop.f32.mrf.mxu0 }
  0x9a   : > { %v268_v7 = vadd.f32 %v433_v6, %v267_v5 }
  0x9c   : > { %v272_v10 = vmax.f32 %v268_v7, 0.0 }
  0xa1   : > { %v269_v8 = vpop.f32.mrf.mxu0 }
  0xa2   : > { %v270_v9 = vadd.f32 %v433_v6, %v269_v8 }
  0xa4   : > { %v273_v11 = vmax.f32 %v270_v9, 0.0 }
  0xa6   : > { %v407_v12 = vpack.c.bf16 %v273_v11, %v272_v10 }
  0xa8   : > { %408 = vst [vmem:[%s208_s5] sm:$0xff] %v407_v12  }
  0xa9 PF: > { %s13_s14 = sadd.s32 1, %s456_s14   ;;  %s530_s12 = smov %s452_s13 }
  0xaa   : > { %p10_p5 = scmp.ge.s32.totalorder %s13_s14, 4   ;;  %s531_s13 = smov %s533_s15 }
  0xac   :  { %12 = sbr.rel (!%p10_p5) target bundleno = 2 (0x2), region = 62 }

// kernel: foldnet_encoder_forward.7
= control target key start
LH: loop header
LB: loop body
LE: loop exit
PB: predicated region body
PF: predicated region fallthrough
CT: control target
= control target key end

     0   :  { %s877_s12 = smov 0   ;;  %s879_s13 = smov 0   ;;  %s1050_s0 = inlined_call_operand.vmem [shape: bf16[2,16,128], index: 0, kind: input, shape index: {}]   ;;  %s1051_s1 = inlined_call_operand.vmem [shape: bf16[128,1024], index: 1, kind: input, shape index: {}]   ;;  %s1052_s2 = inlined_call_operand.vmem [shape: f32[1,1024], index: 2, kind: input, shape index: {}]   ;;  %s1053_s3 = inlined_call_operand.vmem [shape: f32[2,1,1024], index: 3, kind: output, shape index: {}]  }
   0x1   :  { %s881_s14 = smov 0   ;;  %s883_s15 = smov 0  }
   0x2   :  { %s885_s16 = smov 0   ;;  %s887_s17 = smov 0  }
   0x3   :  { %s889_s18 = smov 0  }
   0x4 LB: > { %s28_s19 = sadd.s32 1, %s846_s16  ;;  %s32_s20 = sadd.s32 1, %s850_s17  ;;  %s854_s18 = sphi %s889_s18, %s13_s18   ;;  %s850_s17 = sphi %s887_s17, %s1061_s17   ;;  %s846_s16 = sphi %s885_s16, %s1060_s16   ;;  %s842_s15 = sphi %s883_s15, %s1059_s15   ;;  %s838_s14 = sphi %s881_s14, %s1058_s14   ;;  %s834_s13 = sphi %s879_s13, %s1057_s13   ;;  %s830_s12 = sphi %s877_s12, %s1056_s12  }
   0x5   : > { %p30_p0 = scmp.ge.s32.totalorder %s28_s19, 4  ;;  %s67_s21 = sadd.s32 1, %s834_s13 }
   0x6   : > { %p74_p1 = scmp.ne.s32.totalorder %s834_s13, %s830_s12  ;;  %p75_p2 = scmp.eq.s32.totalorder %s854_s18, 0 }
   0x7   : > { %s1063_s19 = smov (%p30_p0, %s28_s19), 0  ;;  %s1065_s20 = smov (!%p30_p0, %s32_s20), %s850_s17 }
   0x8   : > { %s64_s22 = ssub.s32 %s846_s16, %s1063_s19  ;;  %p76_p3 = por %p75_p2, %p74_p1 }
   0x9   : > { %p34_p4 = scmp.ge.s32.totalorder %s1065_s20, 2  ;;  %p65_p5 = scmp.eq.s32.totalorder %s64_s22, 0 }
   0xa   : > { %p643_p6 = scmp.ge.s32.totalorder %s854_s18, 8 }
   0xb   : > { %s1067_s20 = smov (%p34_p4, %s1065_s20), 0 }
   0xc   : > { %s926_s23 = scalar_select %p65_p5, %s834_s13, %s67_s21  }
   0xd   : > { %154 = sbr.rel (%p643_p6) target bundleno = 38 (0x26), region = 16 }
  0x12   : > { %170 = sbr.rel (!%p76_p3) target bundleno = 38 (0x26), region = 24  ;;  %s172_s24 = sand.u32 (%p76_p3), 1, %s834_s13  }
  0x13   : > { %s724_s25 = sshll.u32 (%p76_p3), %s846_s16, 3  ;;  %s644_s26 = sshll.u32 (%p76_p3), %s172_s24, 7 }
  0x14   : > { %s934_s29 = scalar_lea.vmem (%p76_p3), %s1051_s1, %s724_s25  ;;  %s174_s30 = scalar_lea.vmem (%p76_p3), [#allocation2], %s644_s26 }
  0x15   : > { %v236_v0 = vld [vmem:[%s934_s29] sm:$0xff] (%p76_p3) }
  0x16   : > { %v238_v1 = vld [vmem:[%s934_s29 + $0x20] sm:$0xff] (%p76_p3)  ;;  %237 = vst [vmem:[%s174_s30] sm:$0xff] (%p76_p3), %v236_v0 }
  0x17   : > { %v240_v2 = vld [vmem:[%s934_s29 + $0x40] sm:$0xff]  ;;  %239 = vst [vmem:[%s174_s30 + $0x8] sm:$0xff] %v238_v1 }
  0x18   : > { %v242_v3 = vld [vmem:[%s934_s29 + $0x60] sm:$0xff]  ;;  %241 = vst [vmem:[%s174_s30 + $0x10] sm:$0xff] %v240_v2 }
  0x19   : > { %v244_v4 = vld [vmem:[%s934_s29 + $0x80] sm:$0xff]  ;;  %243 = vst [vmem:[%s174_s30 + $0x18] sm:$0xff] %v242_v3 }
  0x1a   : > { %v246_v5 = vld [vmem:[%s934_s29 + $0xa0] sm:$0xff]  ;;  %245 = vst [vmem:[%s174_s30 + $0x20] sm:$0xff] %v244_v4 }
  0x1b   : > { %v248_v6 = vld [vmem:[%s934_s29 + $0xc0] sm:$0xff]  ;;  %247 = vst [vmem:[%s174_s30 + $0x28] sm:$0xff] %v246_v5 }
  0x1c   : > { %v250_v7 = vld [vmem:[%s934_s29 + $0xe0] sm:$0xff]  ;;  %249 = vst [vmem:[%s174_s30 + $0x30] sm:$0xff] %v248_v6 }
  0x1d   : > { %v252_v8 = vld [vmem:[%s934_s29 + $0x100] sm:$0xff]  ;;  %251 = vst [vmem:[%s174_s30 + $0x38] sm:$0xff] %v250_v7 }
  0x1e   : > { %v254_v9 = vld [vmem:[%s934_s29 + $0x120] sm:$0xff]  ;;  %253 = vst [vmem:[%s174_s30 + $0x40] sm:$0xff] %v252_v8 }
  0x1f   : > { %v256_v10 = vld [vmem:[%s934_s29 + $0x140] sm:$0xff]  ;;  %255 = vst [vmem:[%s174_s30 + $0x48] sm:$0xff] %v254_v9 }
  0x20   : > { %v258_v11 = vld [vmem:[%s934_s29 + $0x160] sm:$0xff]  ;;  %257 = vst [vmem:[%s174_s30 + $0x50] sm:$0xff] %v256_v10 }
  0x21   : > { %v260_v12 = vld [vmem:[%s934_s29 + $0x180] sm:$0xff]  ;;  %259 = vst [vmem:[%s174_s30 + $0x58] sm:$0xff] %v258_v11 }
  0x22   : > { %v262_v13 = vld [vmem:[%s934_s29 + $0x1a0] sm:$0xff]  ;;  %261 = vst [vmem:[%s174_s30 + $0x60] sm:$0xff] %v260_v12 }
  0x23   : > { %v264_v14 = vld [vmem:[%s934_s29 + $0x1c0] sm:$0xff]  ;;  %263 = vst [vmem:[%s174_s30 + $0x68] sm:$0xff] %v262_v13 }
  0x24   : > { %v266_v15 = vld [vmem:[%s934_s29 + $0x1e0] sm:$0xff]  ;;  %265 = vst [vmem:[%s174_s30 + $0x70] sm:$0xff] %v264_v14 }
  0x25   : > { %267 = vst [vmem:[%s174_s30 + $0x78] sm:$0xff] %v266_v15 }
  0x26 PF: > { %p647_p7 = scmp.ge.s32.totalorder %s854_s18, 1  ;;  %p280_p8 = scmp.lt.s32.totalorder %s854_s18, 9 }
  0x28   : > { %p281_p9 = pnand %p647_p7, %p280_p8 }
  0x29   : > { %s287_s4 = sand.u32 (!%p281_p9), 1, %s830_s12   ;;  %s651_s7 = sshll.u32 (!%p281_p9), %s838_s14, 1 }
  0x2a   : > { %284 = sbr.rel (%p281_p9) target bundleno = 246 (0xf6), region = 66  ;;  %s648_s5 = sshll.u32 (!%p281_p9), %s287_s4, 7 }
  0x2b   : > { %s955_s6 = scalar_lea.vmem (!%p281_p9), [#allocation2], %s648_s5  ;;  %p327_p10 = scmp.lt.s32.totalorder (!%p281_p9), %s842_s15, 1 }
  0x2c   : > { %p338_p11 = scmp.lt.s32.totalorder (!%p281_p9), %s651_s7, 7 }
  0x2f   : > { %v716_v16 = vld [vmem:[%s955_s6 + $0x70] sm:$0xf]  ;;  %v741_v17 = vld [vmem:[%s955_s6 + $0x74] sm:$0xf0]  ;;  %v740_v18 = vld [vmem:[%s955_s6 + $0x74] sm:$0xf]  ;;  %v355_v38 = vlaneseq }
  0x30   : > { %v717_v19 = vor.u32 %v741_v17, %v716_v16  ;;  %v718_v20 = vld [vmem:[%s955_s6 + $0x78] sm:$0xf0]  ;;  %v708_v21 = vld [vmem:[%s955_s6 + $0x60] sm:$0xf]  ;;  %v739_v22 = vld [vmem:[%s955_s6 + $0x64] sm:$0xf0] }
  0x31   : > { %v721_v23 = vor.u32 %v740_v18, %v718_v20  ;;  %v738_v24 = vld [vmem:[%s955_s6 + $0x64] sm:$0xf]  ;;  %v710_v25 = vld [vmem:[%s955_s6 + $0x68] sm:$0xf0]  ;;  %v709_v26 = vor.u32 %v739_v22, %v708_v21  ;;  %v700_v28 = vld [vmem:[%s955_s6 + $0x50] sm:$0xf] }
  0x32   : > { %465 = vmatpush.bf16.msra.mxu0 %v717_v19  ;;  %v713_v27 = vor.u32 %v738_v24, %v710_v25  ;;  %v737_v29 = vld [vmem:[%s955_s6 + $0x54] sm:$0xf0]  ;;  %v736_v30 = vld [vmem:[%s955_s6 + $0x54] sm:$0xf]  ;;  %v702_v31 = vld [vmem:[%s955_s6 + $0x58] sm:$0xf0] }
  0x33   : > { %479 = vmatpush.bf16.msra.mxu1 %v721_v23  ;;  %v701_v32 = vor.u32 %v737_v29, %v700_v28  ;;  %v705_v33 = vor.u32 %v736_v30, %v702_v31  ;;  %v692_v34 = vld [vmem:[%s955_s6 + $0x40] sm:$0xf]  ;;  %v735_v35 = vld [vmem:[%s955_s6 + $0x44] sm:$0xf0]  ;;  %v734_v36 = vld [vmem:[%s955_s6 + $0x44] sm:$0xf] }
  0x34   : > { %v694_v37 = vld [vmem:[%s955_s6 + $0x48] sm:$0xf0]  ;;  %s1069_s15 = smov (!%p327_p10, %s842_s15), 1  ;;  %v693_v39 = vor.u32 %v735_v35, %v692_v34  ;;  %s1071_s7 = smov (!%p338_p11, %s651_s7), 7  ;;  %v684_v41 = vld [vmem:[%s955_s6 + $0x30] sm:$0xf] }
  0x35   : > { %v697_v40 = vor.u32 %v734_v36, %v694_v37  ;;  %v733_v42 = vld [vmem:[%s955_s6 + $0x34] sm:$0xf0]  ;;  %v732_v43 = vld [vmem:[%s955_s6 + $0x34] sm:$0xf]  ;;  %v686_v44 = vld [vmem:[%s955_s6 + $0x38] sm:$0xf0]  ;;  %s340_s25 = scalar_lea.vmem %s1052_s2, %s1071_s7 }
  0x36   : > { %466 = vmatpush.bf16.msra.mxu0 %v709_v26  ;;  %s725_s8 = sshll.u32 %s1069_s15, 3  ;;  %vm985_vm0 = vcmp.lt.s32.totalorder %v355_v38, 256  ;;  %v685_v46 = vor.u32 %v733_v42, %v684_v41  ;;  %v689_v47 = vor.u32 %v732_v43, %v686_v44  ;;  %v676_v48 = vld [vmem:[%s955_s6 + $0x20] sm:$0xf]  ;;  %v731_v49 = vld [vmem:[%s955_s6 + $0x24] sm:$0xf0] }
  0x37   : > { %480 = vmatpush.bf16.msra.mxu1 %v713_v27  ;;  %s348_s9 = sadd.s32 %s725_s8, %s1071_s7  ;;  %v856_v50 = vmov -inf   ;;  %v730_v51 = vld [vmem:[%s955_s6 + $0x24] sm:$0xf]  ;;  %v678_v52 = vld [vmem:[%s955_s6 + $0x28] sm:$0xf0]  ;;  %v677_v53 = vor.u32 %v731_v49, %v676_v48  ;;  %s334_s22 = scalar_lea.vmem %s1050_s0, %s725_s8  ;;  %vm510_vm1 = vcmask 1040384  }
  0x38   : > { %s995_s12 = scalar_lea.vmem %s1053_s3, %s348_s9  ;;  %v681_v54 = vor.u32 %v730_v51, %v678_v52  ;;  %v668_v55 = vld [vmem:[%s955_s6 + $0x10] sm:$0xf]  ;;  %v729_v56 = vld [vmem:[%s955_s6 + $0x14] sm:$0xf0]  ;;  %v728_v57 = vld [vmem:[%s955_s6 + $0x14] sm:$0xf] }
  0x39   : > { %359 = vst.msk [vmem:[%s995_s12] sm:$0x3] %vm985_vm0, %v856_v50  ;;  %v670_v58 = vld [vmem:[%s955_s6 + $0x18] sm:$0xf0]  ;;  %v669_v59 = vor.u32 %v729_v56, %v668_v55  ;;  %v660_v61 = vld [vmem:[%s955_s6] sm:$0xf] }
  0x3a   : > { %467 = vmatpush.bf16.msra.mxu0 %v701_v32  ;;  %v673_v60 = vor.u32 %v728_v57, %v670_v58  ;;  %v727_v62 = vld [vmem:[%s955_s6 + $0x4] sm:$0xf0]  ;;  %v726_v63 = vld [vmem:[%s955_s6 + $0x4] sm:$0xf]  ;;  %v662_v0 = vld [vmem:[%s955_s6 + $0x8] sm:$0xf0] }
  0x3b   : > { %481 = vmatpush.bf16.msra.mxu1 %v705_v33  ;;  %v661_v1 = vor.u32 %v727_v62, %v660_v61  ;;  %v665_v2 = vor.u32 %v726_v63, %v662_v0  ;;  %v742_v3 = vld [vmem:[%s334_s22] sm:$0xff] }
  0x3c   : > { %v523_v26 = vld [vmem:[%s340_s25] sm:$0x3] }
  0x3e   : > { %468 = vmatpush.bf16.msra.mxu0 %v693_v39 }
  0x3f   : > { %482 = vmatpush.bf16.msra.mxu1 %v697_v40 }
  0x40   : > { %v376_v21 = vld [vmem:[%s995_s12] sm:$0x3] }
  0x42   : > { %469 = vmatpush.bf16.msra.mxu0 %v685_v46 }
  0x43   : > { %483 = vmatpush.bf16.msra.mxu1 %v689_v47 }
  0x46   : > { %470 = vmatpush.bf16.msra.mxu0 %v677_v53 }
  0x47   : > { %484 = vmatpush.bf16.msra.mxu1 %v681_v54 }
  0x4a   : > { %471 = vmatpush.bf16.msra.mxu0 %v669_v59 }
  0x4b   : > { %485 = vmatpush.bf16.msra.mxu1 %v673_v60 }
  0x4e   : > { %472 = vmatpush.bf16.msra.mxu0 %v661_v1 }
  0x4f   : > { %486 = vmatpush.bf16.msra.mxu1 %v665_v2 }
  0x51   : > { %473 = vmatmul.bf16.vlgmr.msra.gmra.mxu0 %v742_v3 }
  0x52   : > { %487 = vmatmul.bf16.vlgmr.msra.gmra.mxu1 %v742_v3 }
  0xce   : > { %v474_v4 = vpop.f32.mrf.mxu0 }
  0xcf   : > { %v488_v5 = vpop.f32.mrf.mxu1 }
  0xd6   : > { %v476_v6 = vpop.f32.mrf.mxu0 }
  0xd7   : > { %v493_v7 = vmax.f32 %v474_v4, %v476_v6  ;;  %v490_v8 = vpop.f32.mrf.mxu1 }
  0xd8   : > { %v500_v9 = vmax.f32 %v488_v5, %v490_v8 }
  0xd9   : > { %v494_v10 = vrot.slane %v493_v7, 4 }
  0xda   : > { %v501_v11 = vrot.slane %v500_v9, 4 }
  0xdb   : > { %v495_v12 = vmax.f32 %v493_v7, %v494_v10 }
  0xdc   : > { %v502_v13 = vmax.f32 %v500_v9, %v501_v11 }
  0xdd   : > { %v496_v14 = vrot.slane %v495_v12, 2 }
  0xde   : > { %v503_v15 = vrot.slane %v502_v13, 2 }
  0xdf   : > { %v497_v16 = vmax.f32 %v495_v12, %v496_v14 }
  0xe0   : > { %v504_v17 = vmax.f32 %v502_v13, %v503_v15 }
  0xe1   : > { %v498_v18 = vrot.slane %v497_v16, 1 }
  0xe2   : > { %v505_v19 = vrot.slane %v504_v17, 1 }
  0xe3   : > { %v499_v22 = vmax.f32 %v497_v16, %v498_v18 }
  0xe4   : > { %v506_v20 = vmax.f32 %v504_v17, %v505_v19 }
  0xe6   : > { %v509_v23 = vrot.slane %v506_v20, 7 }
  0xe8   : > { %v511_v24 = vsel %vm510_vm1, %v499_v22, %v509_v23 }
  0xe9   : > { %v513_v25 = vmax.f32 %v376_v21, %v511_v24 }
  0xeb   : > { %518 = vst.msk [vmem:[%s995_s12] sm:$0x3] %vm985_vm0, %v513_v25 }
  0xf2   : > { %v522_v27 = vld [vmem:[%s995_s12] sm:$0x3] }
  0xf3   : > { %v524_v28 = vadd.f32 %v523_v26, %v522_v27 }
  0xf5   : > { %525 = vst.msk [vmem:[%s995_s12] sm:$0x3] %vm985_vm0, %v524_v28 }
  0xf6 PF: > { %s13_s18 = sadd.s32 1, %s854_s18   ;;  %s1056_s12 = smov %s834_s13 }
  0xf7   : > { %p10_p12 = scmp.ge.s32.totalorder %s13_s18, 10   ;;  %s1057_s13 = smov %s926_s23 }
  0xf8   : > { %s1058_s14 = smov %s846_s16  ;;  %s1059_s15 = smov %s850_s17 }
  0xf9   : > { %s1060_s16 = smov %s1063_s19  ;;  %s1061_s17 = smov %s1067_s20 }
  0xfa   :  { %12 = sbr.rel (!%p10_p12) target bundleno = 4 (0x4), region = 119 }

</bundles_post_ra>
